<compile_context>
chip_gen: v6e
topology: v6e:2x2x1
jax: 0.10.0
libtpu: 0.0.40
codegen_flags: <defaults>
</compile_context>

<pallas_src>
import functools

import jax
import jax.numpy as jnp
import numpy as np
from jax.experimental import pallas as pl
from jax.experimental.pallas import tpu as pltpu


def _cond_affine_bn_kernel(wp2, n_valid,
                           x_ref, on_ref, mh_ref, mv_ref,
                           w1_ref, b1_ref, w2_ref, b2_ref, w3_ref, b3_ref,
                           sc_ref, ssh_ref,
                           on_out_ref, logdet_ref):
    f32 = jnp.float32
    Ch, P = on_ref.shape            # (cin//2, lane-padded flat width)
    C = b3_ref.shape[0]             # cin
    mmdt = w1_ref.dtype             # matmul operand dtype (bf16)

    def shifted(v, off):
        # out[:, a] = v[:, (a + off) % P].  Wrapped columns only ever land on
        # positions that are masked (mh) or invalid anchors (mv / wrapper slice).
        off = off % v.shape[-1]
        if off == 0:
            return v
        return jnp.concatenate([v[:, off:], v[:, :off]], axis=1)

    # ---- conv1: 3x3 SAME, (cin//2 + ccond) -> 64, + ReLU ----
    # im2col built in-register from 9 lane shifts of the pad-1 input, then a
    # single K = 9*Cin1 MXU contraction.
    x = x_ref[...]                                              # (Cin1, P) f32
    taps = [shifted(x, (dy - 1) * wp2 + (dx - 1))
            for dy in range(3) for dx in range(3)]
    x1 = jnp.concatenate(taps, axis=0).astype(mmdt)             # (9*Cin1, P)
    h1 = jnp.dot(w1_ref[...], x1, preferred_element_type=f32) + b1_ref[...]
    h1 = jnp.maximum(h1, 0.0).astype(mmdt)                      # (64, P)

    # ---- conv2: 1x1, 64 -> 64, + ReLU; zero non-interior columns so conv3
    # taps see exactly the zero padding a SAME 3x3 conv would.
    h2 = jnp.dot(w2_ref[...], h1, preferred_element_type=f32) + b2_ref[...]
    h2 = (jnp.maximum(h2, 0.0) * mh_ref[...]).astype(mmdt)      # (64, P)

    # ---- ZeroConv2d 3x3 (exp(3*zscale) pre-folded into w3/b3): one MXU
    # contraction for all 9 taps x C output rows, then 9 lane-shifted VPU adds
    # of the tile-aligned 8-row groups.
    y = jnp.dot(w3_ref[...], h2, preferred_element_type=f32)    # (9*C, P)
    acc3 = jnp.zeros((C, P), f32)
    for t in range(9):
        off = (t // 3) * wp2 + (t % 3)
        acc3 = acc3 + shifted(y[t * C:(t + 1) * C, :], off)
    out3 = acc3 + b3_ref[...]                                   # (C, P)

    # ---- affine coupling ----
    shift = out3[:Ch, :]
    log_rescale = sc_ref[0, 0] * jnp.tanh(out3[Ch:, :]) + ssh_ref[0, 0]
    on_new = on_ref[...] * jnp.exp(log_rescale) + shift         # (Ch, P)

    # ---- fused statistics: a single masked pass over on_new / log_rescale ----
    mv = mv_ref[...]                                            # (1, P) anchor validity
    inv_n = 1.0 / float(n_valid)
    onv = on_new * mv
    row_sum = jnp.sum(onv, axis=1, keepdims=True)               # (Ch, 1)
    row_sumsq = jnp.sum(onv * on_new, axis=1, keepdims=True)    # (Ch, 1)
    sum_lr = jnp.sum(log_rescale * mv, keepdims=True)           # (1, 1)

    # BatchNorm2d(affine=False), training mode, per-channel stats (one sample).
    bn_mean = row_sum * inv_n
    bn_var = row_sumsq * inv_n - bn_mean * bn_mean
    on_out_ref[...] = (on_new - bn_mean) * jax.lax.rsqrt(bn_var + 1e-5)

    # logdet pieces (per-sample scalar mean/var over all Ch*H*W valid positions).
    m_s = jnp.sum(row_sum, keepdims=True) * (inv_n / Ch)        # (1, 1)
    var_s = jnp.sum(row_sumsq, keepdims=True) * (inv_n / Ch) - m_s * m_s
    logdet_ref[...] = sum_lr - 0.5 * jnp.log(var_s + 1e-5)


def cond_affine_coupling_bn_encode(x, cond, p, matmul_dtype=jnp.bfloat16):
    """x: (N, cin, H, W) NCHW; cond: (N, ccond, H, W). Returns (output NCHW, logdet (N,))."""
    N, C, H, W = x.shape
    assert C % 2 == 0
    Ch = C // 2
    Ccond = cond.shape[1]
    Cin1 = Ch + Ccond
    Wp2, Hp2 = W + 2, H + 2
    n_pad = Hp2 * Wp2                 # real positions of the pad-1 flat grid
    span = H * Wp2                    # flat anchors covering the output rows
    # Lane-padded width: big enough that wrap-around garbage from the largest
    # conv-tap lane shift never reaches a position that is still needed.
    need = max(n_pad,
               (H + 1) * Wp2 + (W + 1) + (Wp2 + 1) + 1,        # conv1 wrap safety
               (H - 1) * Wp2 + (W - 1) + (2 * Wp2 + 2) + 1)    # conv3 wrap safety
    P = ((need + 127) // 128) * 128

    on_nchw = x[:, :Ch]
    off_nchw = x[:, Ch:]

    # pad-1 input (off || cond) on the flat width-Wp2 grid; the conv1 im2col is
    # built in-kernel from lane shifts of this single operand.
    xc = jnp.concatenate([off_nchw, cond], axis=1)                     # (N, Cin1, H, W)
    xp = jnp.pad(xc, ((0, 0), (0, 0), (1, 1), (1, 1))).reshape(N, Cin1, n_pad)
    xpad1 = jnp.pad(xp, ((0, 0), (0, 0), (0, P - n_pad))).astype(jnp.float32)

    # "on" half on the same flat grid (anchor iy*Wp2 + ix; columns ix >= W are pad).
    on_t = jnp.pad(on_nchw, ((0, 0), (0, 0), (0, 0), (0, Wp2 - W)))
    on_t = jnp.pad(on_t.reshape(N, Ch, span), ((0, 0), (0, 0), (0, P - span)))
    on_t = on_t.astype(jnp.float32)

    # ---- static masks ----
    r = np.arange(P)
    py, px = r // Wp2, r % Wp2
    mh = ((r < n_pad) & (py >= 1) & (py <= H) & (px >= 1) & (px <= W))
    mh = jnp.asarray(mh.astype(np.float32).reshape(1, P))              # h2 interior
    mv = ((r < span) & (px < W))
    mv = jnp.asarray(mv.astype(np.float32).reshape(1, P))              # valid anchors

    # ---- parameters (channels-on-sublanes layout; exp(3*zscale) folded into w3/b3) ----
    exp3 = jnp.exp(p["zscale"].astype(jnp.float32) * 3.0)              # (C,)
    w1t = p["w1"].reshape(9 * Cin1, 64).T.astype(matmul_dtype)         # (64, 9*Cin1)
    b1t = p["b1"].reshape(64, 1).astype(jnp.float32)
    w2t = p["w2"].T.astype(matmul_dtype)                               # (64, 64)
    b2t = p["b2"].reshape(64, 1).astype(jnp.float32)
    w3f = jnp.transpose(p["w3"] * exp3[None, None, None, :], (0, 1, 3, 2))
    w3f = w3f.reshape(9 * C, 64).astype(matmul_dtype)                  # (9*C, 64) flat
    b3f = (p["b3"] * exp3).reshape(C, 1).astype(jnp.float32)
    sc = jnp.reshape(p["scale"], (1, 1)).astype(jnp.float32)
    ssh = jnp.reshape(p["scale_shift"], (1, 1)).astype(jnp.float32)

    def batched(shape_tail):
        nt = len(shape_tail)
        return pl.BlockSpec((None,) + tuple(shape_tail),
                            lambda n, _nt=nt: (n,) + (0,) * _nt)

    def const(arr):
        nd = arr.ndim
        return pl.BlockSpec(arr.shape, lambda n, _nd=nd: (0,) * _nd)

    smem = pl.BlockSpec(memory_space=pltpu.MemorySpace.SMEM)

    in_specs = [batched((Cin1, P)), batched((Ch, P)),
                const(mh), const(mv),
                const(w1t), const(b1t), const(w2t), const(b2t),
                const(w3f), const(b3f), smem, smem]
    out_specs = (batched((Ch, P)), batched((1, 1)))
    out_shape = (jax.ShapeDtypeStruct((N, Ch, P), jnp.float32),
                 jax.ShapeDtypeStruct((N, 1, 1), jnp.float32))

    itemb = int(np.dtype(matmul_dtype).itemsize)
    flops = 2 * N * P * 64 * (9 * Cin1 + 64 + 9 * C)
    bytes_accessed = (N * (Cin1 + 2 * Ch + 1) * P * 4 + 2 * P * 4
                      + (w1t.size + w2t.size + w3f.size) * itemb
                      + (b1t.size + b2t.size + b3f.size + 2) * 4)
    cost = pl.CostEstimate(flops=int(flops),
                           transcendentals=int(N * (3 * Ch * P + C + 8)),
                           bytes_accessed=int(bytes_accessed))

    on_bn_t, logdet = pl.pallas_call(
        functools.partial(_cond_affine_bn_kernel, Wp2, H * W),
        grid=(N,),
        in_specs=in_specs,
        out_specs=out_specs,
        out_shape=out_shape,
        compiler_params=pltpu.CompilerParams(dimension_semantics=("parallel",)),
        cost_estimate=cost,
    )(xpad1, on_t, mh, mv, w1t, b1t, w2t, b2t, w3f, b3f, sc, ssh)

    # (N, Ch, P) -> NCHW, dropping padded columns / garbage lanes.
    on_bn = on_bn_t[:, :, :span].reshape(N, Ch, H, Wp2)[:, :, :, :W]
    output = jnp.concatenate([on_bn, off_nchw], axis=1)
    # TODO(synk): BatchNorm running_mean/running_var buffer updates and the host-side
    # print of the batch statistics are stateful/IO side effects, not reproduced here.
    return output, logdet.reshape(N)


def ref_encode(x, cond, p, matmul_dtype=jnp.float32):
    """Pure-JAX per-sample reference (XLA convs).  Matches the PyTorch module exactly
    for batch==1; matmul_dtype casts the conv/matmul operands only (f32 accumulation,
    f32 epilogue), mirroring the kernel."""
    N, C, H, W = x.shape
    Ch = C // 2
    md = matmul_dtype
    on = jnp.transpose(x[:, :Ch], (0, 2, 3, 1))
    off = x[:, Ch:]
    xc = jnp.concatenate([jnp.transpose(off, (0, 2, 3, 1)),
                          jnp.transpose(cond, (0, 2, 3, 1))], axis=-1)
    dn = ("NHWC", "HWIO", "NHWC")
    h = jax.lax.conv_general_dilated(xc.astype(md), p["w1"].astype(md), (1, 1), "SAME",
                                     dimension_numbers=dn,
                                     preferred_element_type=jnp.float32) + p["b1"]
    h = jnp.maximum(h, 0.0)
    h = jnp.einsum("nhwc,cd->nhwd", h.astype(md), p["w2"].astype(md),
                   preferred_element_type=jnp.float32) + p["b2"]
    h = jnp.maximum(h, 0.0)
    exp3 = jnp.exp(p["zscale"] * 3.0)
    w3e = p["w3"] * exp3[None, None, None, :]
    b3e = p["b3"] * exp3
    o3 = jax.lax.conv_general_dilated(h.astype(md), w3e.astype(md), (1, 1), "SAME",
                                      dimension_numbers=dn,
                                      preferred_element_type=jnp.float32) + b3e
    shift, lr = o3[..., :Ch], o3[..., Ch:]
    lr = p["scale"] * jnp.tanh(lr) + p["scale_shift"]
    on_new = on * jnp.exp(lr) + shift
    sum_lr = jnp.sum(lr, axis=(1, 2, 3))
    m = jnp.mean(on_new, axis=(1, 2, 3))
    var = jnp.mean((on_new - m[:, None, None, None]) ** 2, axis=(1, 2, 3))
    bn_mean = jnp.mean(on_new, axis=(1, 2))
    bn_var = jnp.mean((on_new - bn_mean[:, None, None, :]) ** 2, axis=(1, 2))
    on_bn = (on_new - bn_mean[:, None, None, :]) / jnp.sqrt(bn_var[:, None, None, :] + 1e-5)
    logdet = sum_lr - 0.5 * jnp.log(var + 1e-5)
    out = jnp.concatenate([jnp.transpose(on_bn, (0, 3, 1, 2)), off], axis=1)
    return out, logdet


if __name__ == "__main__":
    N, Cin, Ccond, H, W = 2, 8, 4, 16, 16
    Ch = Cin // 2
    Cin1 = Ch + Ccond

    key = jax.random.PRNGKey(0)
    ks = jax.random.split(key, 10)
    x = jax.random.normal(ks[0], (N, Cin, H, W), jnp.float32)
    cond = jax.random.normal(ks[1], (N, Ccond, H, W), jnp.float32)

    # Deterministic synthetic parameters (shapes per the module's __init__).  The real
    # ZeroConv2d starts at zero; small random values keep the computed path non-trivial.
    params = {
        "w1": 0.1 * jax.random.normal(ks[2], (3, 3, Cin1, 64), jnp.float32),
        "b1": 0.05 * jax.random.normal(ks[3], (64,), jnp.float32),
        "w2": 0.1 * jax.random.normal(ks[4], (64, 64), jnp.float32),
        "b2": 0.05 * jax.random.normal(ks[5], (64,), jnp.float32),
        "w3": 0.1 * jax.random.normal(ks[6], (3, 3, 64, Cin), jnp.float32),
        "b3": 0.05 * jax.random.normal(ks[7], (Cin,), jnp.float32),
        "zscale": 0.1 * jax.random.normal(ks[8], (Cin,), jnp.float32),
        "scale": jnp.asarray(0.5, jnp.float32),
        "scale_shift": jnp.asarray(0.1, jnp.float32),
    }

    enc = jax.jit(functools.partial(cond_affine_coupling_bn_encode,
                                    matmul_dtype=jnp.bfloat16))
    out, logdet = enc(x, cond, params)
    out = jax.block_until_ready(out)
    logdet = jax.block_until_ready(logdet)
    assert out.shape == (N, Cin, H, W) and logdet.shape == (N,)

    # Primary check: precision-matched reference (same bf16 matmul operands with the
    # zscale fold, f32 accumulation), different code path (XLA convs) -> tight tol.
    out_ref, logdet_ref = ref_encode(x, cond, params, matmul_dtype=jnp.bfloat16)
    assert np.allclose(np.asarray(out), np.asarray(out_ref), rtol=3e-3, atol=3e-3)
    assert np.allclose(np.asarray(logdet), np.asarray(logdet_ref), rtol=3e-3, atol=3e-3)

    # Secondary sanity check vs the full-f32 reference: bounds bf16 precision loss and
    # the one-pass variance, and catches gross structural errors.
    out_f32, logdet_f32 = ref_encode(x, cond, params, matmul_dtype=jnp.float32)
    assert np.allclose(np.asarray(out), np.asarray(out_f32), rtol=0.1, atol=0.2)
    assert np.allclose(np.asarray(logdet), np.asarray(logdet_f32), rtol=0.05, atol=1.0)

    print("KERNEL_OK")
</pallas_src>

<mosaic_0001>
module attributes {stable_mosaic.version = 11 : i64} {
  func.func @_cond_affine_bn_kernel(%arg0: i32, %arg1: memref<1x8x384xf32, #tpu.memory_space<vmem>>, %arg2: memref<1x4x384xf32, #tpu.memory_space<vmem>>, %arg3: memref<1x384xf32, #tpu.memory_space<vmem>>, %arg4: memref<1x384xf32, #tpu.memory_space<vmem>>, %arg5: memref<64x72xbf16, #tpu.memory_space<vmem>>, %arg6: memref<64x1xf32, #tpu.memory_space<vmem>>, %arg7: memref<64x64xbf16, #tpu.memory_space<vmem>>, %arg8: memref<64x1xf32, #tpu.memory_space<vmem>>, %arg9: memref<72x64xbf16, #tpu.memory_space<vmem>>, %arg10: memref<8x1xf32, #tpu.memory_space<vmem>>, %arg11: memref<1x1xf32, #tpu.memory_space<smem>>, %arg12: memref<1x1xf32, #tpu.memory_space<smem>>, %arg13: memref<1x4x384xf32, #tpu.memory_space<vmem>>, %arg14: memref<1x1x1xf32, #tpu.memory_space<vmem>>) attributes {dimension_semantics = [#tpu.dimension_semantics<parallel>], iteration_bounds = array<i64: 2>, scalar_prefetch = 0 : i64, scratch_operands = 0 : i64, tpu.core_type = #tpu.core_type<tc>, window_params = [{transform_indices = @transform_0, window_bounds = array<i64: 1, 8, 384>}, {transform_indices = @transform_1, window_bounds = array<i64: 1, 4, 384>}, {pipeline_mode = #tpu.pipeline_mode<synchronous>, transform_indices = @transform_2, window_bounds = array<i64: 1, 384>}, {pipeline_mode = #tpu.pipeline_mode<synchronous>, transform_indices = @transform_3, window_bounds = array<i64: 1, 384>}, {pipeline_mode = #tpu.pipeline_mode<synchronous>, transform_indices = @transform_4, window_bounds = array<i64: 64, 72>}, {pipeline_mode = #tpu.pipeline_mode<synchronous>, transform_indices = @transform_5, window_bounds = array<i64: 64, 1>}, {pipeline_mode = #tpu.pipeline_mode<synchronous>, transform_indices = @transform_6, window_bounds = array<i64: 64, 64>}, {pipeline_mode = #tpu.pipeline_mode<synchronous>, transform_indices = @transform_7, window_bounds = array<i64: 64, 1>}, {pipeline_mode = #tpu.pipeline_mode<synchronous>, transform_indices = @transform_8, window_bounds = array<i64: 72, 64>}, {pipeline_mode = #tpu.pipeline_mode<synchronous>, transform_indices = @transform_9, window_bounds = array<i64: 8, 1>}, {transform_indices = @transform_10, window_bounds = array<i64: 1, 1>}, {transform_indices = @transform_11, window_bounds = array<i64: 1, 1>}, {transform_indices = @transform_12, window_bounds = array<i64: 1, 4, 384>}, {transform_indices = @transform_13, window_bounds = array<i64: 1, 1, 1>}]} {
    %c0 = arith.constant 0 : index
    %c0_0 = arith.constant 0 : index
    %c0_1 = arith.constant 0 : index
    %0 = vector.load %arg1[%c0, %c0_0, %c0_1] : memref<1x8x384xf32, #tpu.memory_space<vmem>>, vector<1x8x384xf32>
    %1 = vector.shape_cast %0 : vector<1x8x384xf32> to vector<8x384xf32>
    %2 = vector.extract_strided_slice %1 {offsets = [0, 365], sizes = [8, 19], strides = [1, 1]} : vector<8x384xf32> to vector<8x19xf32>
    %3 = vector.extract_strided_slice %1 {offsets = [0, 0], sizes = [8, 365], strides = [1, 1]} : vector<8x384xf32> to vector<8x365xf32>
    %4 = tpu.concatenate %2, %3 in 1 : vector<8x19xf32>, vector<8x365xf32> -> vector<8x384xf32>
    %5 = vector.extract_strided_slice %1 {offsets = [0, 366], sizes = [8, 18], strides = [1, 1]} : vector<8x384xf32> to vector<8x18xf32>
    %6 = vector.extract_strided_slice %1 {offsets = [0, 0], sizes = [8, 366], strides = [1, 1]} : vector<8x384xf32> to vector<8x366xf32>
    %7 = tpu.concatenate %5, %6 in 1 : vector<8x18xf32>, vector<8x366xf32> -> vector<8x384xf32>
    %8 = vector.extract_strided_slice %1 {offsets = [0, 367], sizes = [8, 17], strides = [1, 1]} : vector<8x384xf32> to vector<8x17xf32>
    %9 = vector.extract_strided_slice %1 {offsets = [0, 0], sizes = [8, 367], strides = [1, 1]} : vector<8x384xf32> to vector<8x367xf32>
    %10 = tpu.concatenate %8, %9 in 1 : vector<8x17xf32>, vector<8x367xf32> -> vector<8x384xf32>
    %11 = vector.extract_strided_slice %1 {offsets = [0, 383], sizes = [8, 1], strides = [1, 1]} : vector<8x384xf32> to vector<8x1xf32>
    %12 = vector.extract_strided_slice %1 {offsets = [0, 0], sizes = [8, 383], strides = [1, 1]} : vector<8x384xf32> to vector<8x383xf32>
    %13 = tpu.concatenate %11, %12 in 1 : vector<8x1xf32>, vector<8x383xf32> -> vector<8x384xf32>
    %14 = vector.extract_strided_slice %1 {offsets = [0, 1], sizes = [8, 383], strides = [1, 1]} : vector<8x384xf32> to vector<8x383xf32>
    %15 = vector.extract_strided_slice %1 {offsets = [0, 0], sizes = [8, 1], strides = [1, 1]} : vector<8x384xf32> to vector<8x1xf32>
    %16 = tpu.concatenate %14, %15 in 1 : vector<8x383xf32>, vector<8x1xf32> -> vector<8x384xf32>
    %17 = vector.extract_strided_slice %1 {offsets = [0, 17], sizes = [8, 367], strides = [1, 1]} : vector<8x384xf32> to vector<8x367xf32>
    %18 = vector.extract_strided_slice %1 {offsets = [0, 0], sizes = [8, 17], strides = [1, 1]} : vector<8x384xf32> to vector<8x17xf32>
    %19 = tpu.concatenate %17, %18 in 1 : vector<8x367xf32>, vector<8x17xf32> -> vector<8x384xf32>
    %20 = vector.extract_strided_slice %1 {offsets = [0, 18], sizes = [8, 366], strides = [1, 1]} : vector<8x384xf32> to vector<8x366xf32>
    %21 = vector.extract_strided_slice %1 {offsets = [0, 0], sizes = [8, 18], strides = [1, 1]} : vector<8x384xf32> to vector<8x18xf32>
    %22 = tpu.concatenate %20, %21 in 1 : vector<8x366xf32>, vector<8x18xf32> -> vector<8x384xf32>
    %23 = vector.extract_strided_slice %1 {offsets = [0, 19], sizes = [8, 365], strides = [1, 1]} : vector<8x384xf32> to vector<8x365xf32>
    %24 = vector.extract_strided_slice %1 {offsets = [0, 0], sizes = [8, 19], strides = [1, 1]} : vector<8x384xf32> to vector<8x19xf32>
    %25 = tpu.concatenate %23, %24 in 1 : vector<8x365xf32>, vector<8x19xf32> -> vector<8x384xf32>
    %26 = tpu.concatenate %4, %7, %10, %13, %1, %16, %19, %22, %25 in 0 : vector<8x384xf32>, vector<8x384xf32>, vector<8x384xf32>, vector<8x384xf32>, vector<8x384xf32>, vector<8x384xf32>, vector<8x384xf32>, vector<8x384xf32>, vector<8x384xf32> -> vector<72x384xf32>
    %27 = arith.truncf %26 : vector<72x384xf32> to vector<72x384xbf16>
    %c0_2 = arith.constant 0 : index
    %c0_3 = arith.constant 0 : index
    %28 = vector.load %arg5[%c0_2, %c0_3] : memref<64x72xbf16, #tpu.memory_space<vmem>>, vector<64x72xbf16>
    %cst = arith.constant dense<0.000000e+00> : vector<64x384xf32>
    %29 = tpu.matmul %28, %27, %cst {dimension_numbers = #tpu.dot_dimension_numbers<[1], [0], [0], [1], [0, 0, 1, 1], [], []>} : vector<64x72xbf16>, vector<72x384xbf16>, vector<64x384xf32> -> vector<64x384xf32>
    %c0_4 = arith.constant 0 : index
    %c0_5 = arith.constant 0 : index
    %30 = vector.load %arg6[%c0_4, %c0_5] : memref<64x1xf32, #tpu.memory_space<vmem>>, vector<64x1xf32>
    %31 = vector.broadcast %30 : vector<64x1xf32> to vector<64x384xf32>
    %32 = arith.addf %29, %31 : vector<64x384xf32>
    %cst_6 = arith.constant 0.000000e+00 : f32
    %33 = vector.broadcast %cst_6 : f32 to vector<64x384xf32>
    %34 = arith.maximumf %32, %33 : vector<64x384xf32>
    %35 = arith.truncf %34 : vector<64x384xf32> to vector<64x384xbf16>
    %c0_7 = arith.constant 0 : index
    %c0_8 = arith.constant 0 : index
    %36 = vector.load %arg7[%c0_7, %c0_8] : memref<64x64xbf16, #tpu.memory_space<vmem>>, vector<64x64xbf16>
    %cst_9 = arith.constant dense<0.000000e+00> : vector<64x384xf32>
    %37 = tpu.matmul %36, %35, %cst_9 {dimension_numbers = #tpu.dot_dimension_numbers<[1], [0], [0], [1], [0, 0, 1, 1], [], []>} : vector<64x64xbf16>, vector<64x384xbf16>, vector<64x384xf32> -> vector<64x384xf32>
    %c0_10 = arith.constant 0 : index
    %c0_11 = arith.constant 0 : index
    %38 = vector.load %arg8[%c0_10, %c0_11] : memref<64x1xf32, #tpu.memory_space<vmem>>, vector<64x1xf32>
    %39 = vector.broadcast %38 : vector<64x1xf32> to vector<64x384xf32>
    %40 = arith.addf %37, %39 : vector<64x384xf32>
    %cst_12 = arith.constant 0.000000e+00 : f32
    %41 = vector.broadcast %cst_12 : f32 to vector<64x384xf32>
    %42 = arith.maximumf %40, %41 : vector<64x384xf32>
    %c0_13 = arith.constant 0 : index
    %c0_14 = arith.constant 0 : index
    %43 = vector.load %arg3[%c0_13, %c0_14] : memref<1x384xf32, #tpu.memory_space<vmem>>, vector<1x384xf32>
    %44 = vector.broadcast %43 : vector<1x384xf32> to vector<64x384xf32>
    %45 = arith.mulf %42, %44 : vector<64x384xf32>
    %46 = arith.truncf %45 : vector<64x384xf32> to vector<64x384xbf16>
    %c0_15 = arith.constant 0 : index
    %c0_16 = arith.constant 0 : index
    %47 = vector.load %arg9[%c0_15, %c0_16] : memref<72x64xbf16, #tpu.memory_space<vmem>>, vector<72x64xbf16>
    %cst_17 = arith.constant dense<0.000000e+00> : vector<72x384xf32>
    %48 = tpu.matmul %47, %46, %cst_17 {dimension_numbers = #tpu.dot_dimension_numbers<[1], [0], [0], [1], [0, 0, 1, 1], [], []>} : vector<72x64xbf16>, vector<64x384xbf16>, vector<72x384xf32> -> vector<72x384xf32>
    %cst_18 = arith.constant 0.000000e+00 : f32
    %49 = vector.broadcast %cst_18 : f32 to vector<8x384xf32>
    %50 = vector.extract_strided_slice %48 {offsets = [0, 0], sizes = [8, 384], strides = [1, 1]} : vector<72x384xf32> to vector<8x384xf32>
    %51 = arith.addf %49, %50 : vector<8x384xf32>
    %52 = vector.extract_strided_slice %48 {offsets = [8, 0], sizes = [8, 384], strides = [1, 1]} : vector<72x384xf32> to vector<8x384xf32>
    %53 = vector.extract_strided_slice %52 {offsets = [0, 1], sizes = [8, 383], strides = [1, 1]} : vector<8x384xf32> to vector<8x383xf32>
    %54 = vector.extract_strided_slice %52 {offsets = [0, 0], sizes = [8, 1], strides = [1, 1]} : vector<8x384xf32> to vector<8x1xf32>
    %55 = tpu.concatenate %53, %54 in 1 : vector<8x383xf32>, vector<8x1xf32> -> vector<8x384xf32>
    %56 = arith.addf %51, %55 : vector<8x384xf32>
    %57 = vector.extract_strided_slice %48 {offsets = [16, 0], sizes = [8, 384], strides = [1, 1]} : vector<72x384xf32> to vector<8x384xf32>
    %58 = vector.extract_strided_slice %57 {offsets = [0, 2], sizes = [8, 382], strides = [1, 1]} : vector<8x384xf32> to vector<8x382xf32>
    %59 = vector.extract_strided_slice %57 {offsets = [0, 0], sizes = [8, 2], strides = [1, 1]} : vector<8x384xf32> to vector<8x2xf32>
    %60 = tpu.concatenate %58, %59 in 1 : vector<8x382xf32>, vector<8x2xf32> -> vector<8x384xf32>
    %61 = arith.addf %56, %60 : vector<8x384xf32>
    %62 = vector.extract_strided_slice %48 {offsets = [24, 0], sizes = [8, 384], strides = [1, 1]} : vector<72x384xf32> to vector<8x384xf32>
    %63 = vector.extract_strided_slice %62 {offsets = [0, 18], sizes = [8, 366], strides = [1, 1]} : vector<8x384xf32> to vector<8x366xf32>
    %64 = vector.extract_strided_slice %62 {offsets = [0, 0], sizes = [8, 18], strides = [1, 1]} : vector<8x384xf32> to vector<8x18xf32>
    %65 = tpu.concatenate %63, %64 in 1 : vector<8x366xf32>, vector<8x18xf32> -> vector<8x384xf32>
    %66 = arith.addf %61, %65 : vector<8x384xf32>
    %67 = vector.extract_strided_slice %48 {offsets = [32, 0], sizes = [8, 384], strides = [1, 1]} : vector<72x384xf32> to vector<8x384xf32>
    %68 = vector.extract_strided_slice %67 {offsets = [0, 19], sizes = [8, 365], strides = [1, 1]} : vector<8x384xf32> to vector<8x365xf32>
    %69 = vector.extract_strided_slice %67 {offsets = [0, 0], sizes = [8, 19], strides = [1, 1]} : vector<8x384xf32> to vector<8x19xf32>
    %70 = tpu.concatenate %68, %69 in 1 : vector<8x365xf32>, vector<8x19xf32> -> vector<8x384xf32>
    %71 = arith.addf %66, %70 : vector<8x384xf32>
    %72 = vector.extract_strided_slice %48 {offsets = [40, 0], sizes = [8, 384], strides = [1, 1]} : vector<72x384xf32> to vector<8x384xf32>
    %73 = vector.extract_strided_slice %72 {offsets = [0, 20], sizes = [8, 364], strides = [1, 1]} : vector<8x384xf32> to vector<8x364xf32>
    %74 = vector.extract_strided_slice %72 {offsets = [0, 0], sizes = [8, 20], strides = [1, 1]} : vector<8x384xf32> to vector<8x20xf32>
    %75 = tpu.concatenate %73, %74 in 1 : vector<8x364xf32>, vector<8x20xf32> -> vector<8x384xf32>
    %76 = arith.addf %71, %75 : vector<8x384xf32>
    %77 = vector.extract_strided_slice %48 {offsets = [48, 0], sizes = [8, 384], strides = [1, 1]} : vector<72x384xf32> to vector<8x384xf32>
    %78 = vector.extract_strided_slice %77 {offsets = [0, 36], sizes = [8, 348], strides = [1, 1]} : vector<8x384xf32> to vector<8x348xf32>
    %79 = vector.extract_strided_slice %77 {offsets = [0, 0], sizes = [8, 36], strides = [1, 1]} : vector<8x384xf32> to vector<8x36xf32>
    %80 = tpu.concatenate %78, %79 in 1 : vector<8x348xf32>, vector<8x36xf32> -> vector<8x384xf32>
    %81 = arith.addf %76, %80 : vector<8x384xf32>
    %82 = vector.extract_strided_slice %48 {offsets = [56, 0], sizes = [8, 384], strides = [1, 1]} : vector<72x384xf32> to vector<8x384xf32>
    %83 = vector.extract_strided_slice %82 {offsets = [0, 37], sizes = [8, 347], strides = [1, 1]} : vector<8x384xf32> to vector<8x347xf32>
    %84 = vector.extract_strided_slice %82 {offsets = [0, 0], sizes = [8, 37], strides = [1, 1]} : vector<8x384xf32> to vector<8x37xf32>
    %85 = tpu.concatenate %83, %84 in 1 : vector<8x347xf32>, vector<8x37xf32> -> vector<8x384xf32>
    %86 = arith.addf %81, %85 : vector<8x384xf32>
    %87 = vector.extract_strided_slice %48 {offsets = [64, 0], sizes = [8, 384], strides = [1, 1]} : vector<72x384xf32> to vector<8x384xf32>
    %88 = vector.extract_strided_slice %87 {offsets = [0, 38], sizes = [8, 346], strides = [1, 1]} : vector<8x384xf32> to vector<8x346xf32>
    %89 = vector.extract_strided_slice %87 {offsets = [0, 0], sizes = [8, 38], strides = [1, 1]} : vector<8x384xf32> to vector<8x38xf32>
    %90 = tpu.concatenate %88, %89 in 1 : vector<8x346xf32>, vector<8x38xf32> -> vector<8x384xf32>
    %91 = arith.addf %86, %90 : vector<8x384xf32>
    %c0_19 = arith.constant 0 : index
    %c0_20 = arith.constant 0 : index
    %92 = vector.load %arg10[%c0_19, %c0_20] : memref<8x1xf32, #tpu.memory_space<vmem>>, vector<8x1xf32>
    %93 = vector.broadcast %92 : vector<8x1xf32> to vector<8x384xf32>
    %94 = arith.addf %91, %93 : vector<8x384xf32>
    %95 = vector.extract_strided_slice %94 {offsets = [0, 0], sizes = [4, 384], strides = [1, 1]} : vector<8x384xf32> to vector<4x384xf32>
    %c0_21 = arith.constant 0 : index
    %c0_22 = arith.constant 0 : index
    %96 = memref.load %arg11[%c0_21, %c0_22] : memref<1x1xf32, #tpu.memory_space<smem>>
    %97 = vector.extract_strided_slice %94 {offsets = [4, 0], sizes = [4, 384], strides = [1, 1]} : vector<8x384xf32> to vector<4x384xf32>
    %98 = math.tanh %97 : vector<4x384xf32>
    %99 = vector.broadcast %96 : f32 to vector<4x384xf32>
    %100 = arith.mulf %99, %98 : vector<4x384xf32>
    %c0_23 = arith.constant 0 : index
    %c0_24 = arith.constant 0 : index
    %101 = memref.load %arg12[%c0_23, %c0_24] : memref<1x1xf32, #tpu.memory_space<smem>>
    %102 = vector.broadcast %101 : f32 to vector<4x384xf32>
    %103 = arith.addf %100, %102 : vector<4x384xf32>
    %c0_25 = arith.constant 0 : index
    %c0_26 = arith.constant 0 : index
    %c0_27 = arith.constant 0 : index
    %104 = vector.load %arg2[%c0_25, %c0_26, %c0_27] : memref<1x4x384xf32, #tpu.memory_space<vmem>>, vector<1x4x384xf32>
    %105 = vector.shape_cast %104 : vector<1x4x384xf32> to vector<4x384xf32>
    %106 = math.exp %103 : vector<4x384xf32>
    %107 = arith.mulf %105, %106 : vector<4x384xf32>
    %108 = arith.addf %107, %95 : vector<4x384xf32>
    %c0_28 = arith.constant 0 : index
    %c0_29 = arith.constant 0 : index
    %109 = vector.load %arg4[%c0_28, %c0_29] : memref<1x384xf32, #tpu.memory_space<vmem>>, vector<1x384xf32>
    %110 = vector.broadcast %109 : vector<1x384xf32> to vector<4x384xf32>
    %111 = arith.mulf %108, %110 : vector<4x384xf32>
    %cst_30 = arith.constant dense<0.000000e+00> : vector<4xf32>
    %112 = vector.multi_reduction <add>, %111, %cst_30 [1] : vector<4x384xf32> to vector<4xf32>
    %113 = vector.shape_cast %112 : vector<4xf32> to vector<4x1xf32>
    %114 = arith.mulf %111, %108 : vector<4x384xf32>
    %cst_31 = arith.constant dense<0.000000e+00> : vector<4xf32>
    %115 = vector.multi_reduction <add>, %114, %cst_31 [1] : vector<4x384xf32> to vector<4xf32>
    %116 = vector.shape_cast %115 : vector<4xf32> to vector<4x1xf32>
    %117 = vector.broadcast %109 : vector<1x384xf32> to vector<4x384xf32>
    %118 = arith.mulf %103, %117 : vector<4x384xf32>
    %119 = vector.shape_cast %118 : vector<4x384xf32> to vector<1x4x384xf32>
    %cst_32 = arith.constant dense<0.000000e+00> : vector<1xf32>
    %120 = vector.multi_reduction <add>, %119, %cst_32 [1, 2] : vector<1x4x384xf32> to vector<1xf32>
    %121 = vector.shape_cast %120 : vector<1xf32> to vector<1x1x1xf32>
    %122 = vector.extract %121[0, 0, 0] : f32 from vector<1x1x1xf32>
    %123 = vector.broadcast %122 : f32 to vector<1x1xf32>
    %cst_33 = arith.constant 3.906250e-03 : f32
    %124 = vector.broadcast %cst_33 : f32 to vector<4x1xf32>
    %125 = arith.mulf %113, %124 : vector<4x1xf32>
    %cst_34 = arith.constant 3.906250e-03 : f32
    %126 = vector.broadcast %cst_34 : f32 to vector<4x1xf32>
    %127 = arith.mulf %116, %126 : vector<4x1xf32>
    %128 = arith.mulf %125, %125 : vector<4x1xf32>
    %129 = arith.subf %127, %128 : vector<4x1xf32>
    %130 = vector.broadcast %125 : vector<4x1xf32> to vector<4x384xf32>
    %131 = arith.subf %108, %130 : vector<4x384xf32>
    %cst_35 = arith.constant 9.99999974E-6 : f32
    %132 = vector.broadcast %cst_35 : f32 to vector<4x1xf32>
    %133 = arith.addf %129, %132 : vector<4x1xf32>
    %134 = math.rsqrt %133 : vector<4x1xf32>
    %135 = vector.broadcast %134 : vector<4x1xf32> to vector<4x384xf32>
    %136 = arith.mulf %131, %135 : vector<4x384xf32>
    %c0_36 = arith.constant 0 : index
    %c0_37 = arith.constant 0 : index
    %c0_38 = arith.constant 0 : index
    %137 = vector.load %arg13[%c0_36, %c0_37, %c0_38] : memref<1x4x384xf32, #tpu.memory_space<vmem>>, vector<1x4x384xf32>
    %138 = vector.shape_cast %137 : vector<1x4x384xf32> to vector<4x384xf32>
    %139 = vector.shape_cast %136 : vector<4x384xf32> to vector<1x4x384xf32>
    tpu.vector_store %arg13[%c0_36, %c0_37, %c0_38], %139 {strides = array<i32>} : memref<1x4x384xf32, #tpu.memory_space<vmem>>, vector<1x4x384xf32>,
    %140 = vector.shape_cast %113 : vector<4x1xf32> to vector<1x4x1xf32>
    %cst_39 = arith.constant dense<0.000000e+00> : vector<1xf32>
    %141 = vector.multi_reduction <add>, %140, %cst_39 [1, 2] : vector<1x4x1xf32> to vector<1xf32>
    %142 = vector.shape_cast %141 : vector<1xf32> to vector<1x1x1xf32>
    %143 = vector.extract %142[0, 0, 0] : f32 from vector<1x1x1xf32>
    %144 = vector.broadcast %143 : f32 to vector<1x1xf32>
    %cst_40 = arith.constant 9.765625E-4 : f32
    %145 = vector.broadcast %cst_40 : f32 to vector<1x1xf32>
    %146 = arith.mulf %144, %145 : vector<1x1xf32>
    %147 = vector.shape_cast %116 : vector<4x1xf32> to vector<1x4x1xf32>
    %cst_41 = arith.constant dense<0.000000e+00> : vector<1xf32>
    %148 = vector.multi_reduction <add>, %147, %cst_41 [1, 2] : vector<1x4x1xf32> to vector<1xf32>
    %149 = vector.shape_cast %148 : vector<1xf32> to vector<1x1x1xf32>
    %150 = vector.extract %149[0, 0, 0] : f32 from vector<1x1x1xf32>
    %151 = vector.broadcast %150 : f32 to vector<1x1xf32>
    %cst_42 = arith.constant 9.765625E-4 : f32
    %152 = vector.broadcast %cst_42 : f32 to vector<1x1xf32>
    %153 = arith.mulf %151, %152 : vector<1x1xf32>
    %154 = arith.mulf %146, %146 : vector<1x1xf32>
    %155 = arith.subf %153, %154 : vector<1x1xf32>
    %cst_43 = arith.constant 9.99999974E-6 : f32
    %156 = vector.broadcast %cst_43 : f32 to vector<1x1xf32>
    %157 = arith.addf %155, %156 : vector<1x1xf32>
    %158 = math.log %157 : vector<1x1xf32>
    %cst_44 = arith.constant 5.000000e-01 : f32
    %159 = vector.broadcast %cst_44 : f32 to vector<1x1xf32>
    %160 = arith.mulf %159, %158 : vector<1x1xf32>
    %161 = arith.subf %123, %160 : vector<1x1xf32>
    %c0_45 = arith.constant 0 : index
    %c0_46 = arith.constant 0 : index
    %c0_47 = arith.constant 0 : index
    %162 = vector.load %arg14[%c0_45, %c0_46, %c0_47] : memref<1x1x1xf32, #tpu.memory_space<vmem>>, vector<1x1x1xf32>
    %163 = vector.shape_cast %162 : vector<1x1x1xf32> to vector<1x1xf32>
    %164 = vector.shape_cast %161 : vector<1x1xf32> to vector<1x1x1xf32>
    tpu.vector_store %arg14[%c0_45, %c0_46, %c0_47], %164 {strides = array<i32>} : memref<1x1x1xf32, #tpu.memory_space<vmem>>, vector<1x1x1xf32>,
    return
  }
  func.func @transform_0(%arg0: i32) -> (i32, i32, i32) {
    %c0_i32 = arith.constant 0 : i32
    %c0_i32_0 = arith.constant 0 : i32
    %c0_i32_1 = arith.constant 0 : i32
    return %arg0, %c0_i32, %c0_i32_0 : i32, i32, i32
  }
  func.func @transform_1(%arg0: i32) -> (i32, i32, i32) {
    %c0_i32 = arith.constant 0 : i32
    %c0_i32_0 = arith.constant 0 : i32
    %c0_i32_1 = arith.constant 0 : i32
    return %arg0, %c0_i32, %c0_i32_0 : i32, i32, i32
  }
  func.func @transform_2(%arg0: i32) -> (i32, i32) {
    %c0_i32 = arith.constant 0 : i32
    %c0_i32_0 = arith.constant 0 : i32
    %c0_i32_1 = arith.constant 0 : i32
    return %c0_i32, %c0_i32_0 : i32, i32
  }
  func.func @transform_3(%arg0: i32) -> (i32, i32) {
    %c0_i32 = arith.constant 0 : i32
    %c0_i32_0 = arith.constant 0 : i32
    %c0_i32_1 = arith.constant 0 : i32
    return %c0_i32, %c0_i32_0 : i32, i32
  }
  func.func @transform_4(%arg0: i32) -> (i32, i32) {
    %c0_i32 = arith.constant 0 : i32
    %c0_i32_0 = arith.constant 0 : i32
    %c0_i32_1 = arith.constant 0 : i32
    return %c0_i32, %c0_i32_0 : i32, i32
  }
  func.func @transform_5(%arg0: i32) -> (i32, i32) {
    %c0_i32 = arith.constant 0 : i32
    %c0_i32_0 = arith.constant 0 : i32
    %c0_i32_1 = arith.constant 0 : i32
    return %c0_i32, %c0_i32_0 : i32, i32
  }
  func.func @transform_6(%arg0: i32) -> (i32, i32) {
    %c0_i32 = arith.constant 0 : i32
    %c0_i32_0 = arith.constant 0 : i32
    %c0_i32_1 = arith.constant 0 : i32
    return %c0_i32, %c0_i32_0 : i32, i32
  }
  func.func @transform_7(%arg0: i32) -> (i32, i32) {
    %c0_i32 = arith.constant 0 : i32
    %c0_i32_0 = arith.constant 0 : i32
    %c0_i32_1 = arith.constant 0 : i32
    return %c0_i32, %c0_i32_0 : i32, i32
  }
  func.func @transform_8(%arg0: i32) -> (i32, i32) {
    %c0_i32 = arith.constant 0 : i32
    %c0_i32_0 = arith.constant 0 : i32
    %c0_i32_1 = arith.constant 0 : i32
    return %c0_i32, %c0_i32_0 : i32, i32
  }
  func.func @transform_9(%arg0: i32) -> (i32, i32) {
    %c0_i32 = arith.constant 0 : i32
    %c0_i32_0 = arith.constant 0 : i32
    %c0_i32_1 = arith.constant 0 : i32
    return %c0_i32, %c0_i32_0 : i32, i32
  }
  func.func @transform_10(%arg0: i32) -> (i32, i32) {
    %c0_i32 = arith.constant 0 : i32
    %c0_i32_0 = arith.constant 0 : i32
    %c0_i32_1 = arith.constant 0 : i32
    return %c0_i32, %c0_i32_0 : i32, i32
  }
  func.func @transform_11(%arg0: i32) -> (i32, i32) {
    %c0_i32 = arith.constant 0 : i32
    %c0_i32_0 = arith.constant 0 : i32
    %c0_i32_1 = arith.constant 0 : i32
    return %c0_i32, %c0_i32_0 : i32, i32
  }
  func.func @transform_12(%arg0: i32) -> (i32, i32, i32) {
    %c0_i32 = arith.constant 0 : i32
    %c0_i32_0 = arith.constant 0 : i32
    %c0_i32_1 = arith.constant 0 : i32
    return %arg0, %c0_i32, %c0_i32_0 : i32, i32, i32
  }
  func.func @transform_13(%arg0: i32) -> (i32, i32, i32) {
    %c0_i32 = arith.constant 0 : i32
    %c0_i32_0 = arith.constant 0 : i32
    %c0_i32_1 = arith.constant 0 : i32
    return %arg0, %c0_i32, %c0_i32_0 : i32, i32, i32
  }
}

</mosaic_0001>

<bundles_post_ra>
// kernel: cond_affine_coupling_bn_encode.1
= control target key start
LH: loop header
LB: loop body
LE: loop exit
PB: predicated region body
PF: predicated region fallthrough
CT: control target
= control target key end

     0   :  { %s2158_s29 = smov 0   ;;  %s2579_s0 = inlined_call_operand.vmem [shape: f32[2,8,384], index: 0, kind: input, shape index: {}]   ;;  %s2580_s1 = inlined_call_operand.vmem [shape: f32[2,4,384], index: 1, kind: input, shape index: {}]   ;;  %s2581_s2 = inlined_call_operand.vmem [shape: f32[1,384], index: 2, kind: input, shape index: {}]   ;;  %s2582_s3 = inlined_call_operand.vmem [shape: f32[1,384], index: 3, kind: input, shape index: {}]   ;;  %s2583_s4 = inlined_call_operand.vmem [shape: bf16[64,72], index: 4, kind: input, shape index: {}]   ;;  %s2584_s5 = inlined_call_operand.vmem [shape: f32[64,1], index: 5, kind: input, shape index: {}]   ;;  %s2585_s6 = inlined_call_operand.vmem [shape: bf16[64,64], index: 6, kind: input, shape index: {}]   ;;  %s2586_s7 = inlined_call_operand.vmem [shape: f32[64,1], index: 7, kind: input, shape index: {}]   ;;  %s2587_s8 = inlined_call_operand.vmem [shape: bf16[72,64], index: 8, kind: input, shape index: {}]   ;;  %s2588_s9 = inlined_call_operand.vmem [shape: f32[8,1], index: 9, kind: input, shape index: {}]   ;;  %s2589_s10 = inlined_call_operand.<no memory space> [shape: f32[1,1], index: 10, kind: input, shape index: {}]   ;;  %s2590_s11 = inlined_call_operand.<no memory space> [shape: f32[1,1], index: 11, kind: input, shape index: {}]   ;;  %s2591_s12 = inlined_call_operand.vmem [shape: f32[2,4,384], index: 12, kind: output, shape index: {0}]   ;;  %s2592_s13 = inlined_call_operand.vmem [shape: f32[2,1,1], index: 13, kind: output, shape index: {1}]  }
   0x1   :  { %19 = sst [smem:[#allocation2]] %s2589_s10 }
   0x2   :  { %20 = sst [smem:[#allocation3]] %s2590_s11 }
   0x3 LB: > { %s1814_s30 = sadd.s32 4294967295, %s2063_s29   ;;  %p1818_p0 = scmp.ge.s32.totalorder %s2063_s29, 1  ;;  %s2063_s29 = sphi %s2158_s29, %s26_s29  }
   0x4   : > { %p402_p1 = scmp.lt.s32.totalorder %s2063_s29, 3 }
   0x6   : > { %p403_p2 = pnand %p1818_p0, %p402_p1 }
   0x7   : > { %p454_p3 = scmp.lt.s32.totalorder (!%p403_p2), %s1814_s30, 1  ;;  %s2065_s16 = smov (!%p403_p2), 111  }
   0x8   : > { %406 = sbr.rel (%p403_p2) target bundleno = 1430 (0x596), region = 68  ;;  %s2066_s17 = smov (!%p403_p2), 109  }
   0x9   : > { %s2067_s18 = smov (!%p403_p2), 110   ;;  %s2068_s19 = smov (!%p403_p2), 127  }
   0xa   : > { %s2069_s20 = smov (!%p403_p2), 1   ;;  %s2070_s21 = smov (!%p403_p2), 17  }
   0xb   : > { %s2072_s24 = smov (!%p403_p2), 18   ;;  %s2073_s25 = smov (!%p403_p2), 19  }
   0xc   : > { %s2076_s11 = smov (!%p403_p2), 126   ;;  %s2077_s14 = smov (!%p403_p2), 108  }
   0xd   : > { %s2594_s30 = smov (!%p454_p3, %s1814_s30), 1  ;;  %v2195_v5 = vld [vmem:[%s2583_s4] sm:$0xff]   ;;  %vm682_vm0 = vcmask 588800   ;;  %v2071_v6 = vmov 0   ;;  %v620_v7 = vld [vmem:[%s2584_s5 + $0x30] sm:$0xff]  ;;  %v621_v8 = vld [vmem:[%s2584_s5 + $0x38] sm:$0xff] }
   0xe   : > { %s1953_s10 = smul.u32 24, %s2594_s30  ;;  %737 = vmatprep.mubr.bf16.mxu0 %v2071_v6  ;;  %1900 = vmatprep.mubr.msk.bf16.mxu1 %vm682_vm0, %v2195_v5  ;;  %v619_v9 = vld [vmem:[%s2584_s5 + $0x28] sm:$0xff]  ;;  %v618_v10 = vld [vmem:[%s2584_s5 + $0x20] sm:$0xff]  ;;  %v617_v11 = vld [vmem:[%s2584_s5 + $0x18] sm:$0xff]  ;;  %vm583_vm1 = vcmask 891904   ;;  %vm569_vm2 = vcmask 900096  }
   0xf   : > { %2026 = vset.pattern.permute.xlu0 %v2071_v6  ;;  %2027 = vset.pattern.permute.xlu1 %v2071_v6  ;;  %v616_v12 = vld [vmem:[%s2584_s5 + $0x10] sm:$0xff]  ;;  %v615_v13 = vld [vmem:[%s2584_s5 + $0x8] sm:$0xff]  ;;  %v614_v14 = vld [vmem:[%s2584_s5] sm:$0xff]  ;;  %vm555_vm3 = vcmask 908288   ;;  %vm695_vm4 = vcmask 1043456   ;;  %vm541_vm5 = vcmask 1039360  }
  0x10   : > { %s458_s15 = scalar_lea.vmem %s2579_s0, %s1953_s10  ;;  %v894_v15 = vld [vmem:[%s2586_s7 + $0x38] sm:$0xff]  ;;  %v893_v16 = vld [vmem:[%s2586_s7 + $0x30] sm:$0xff]  ;;  %v892_v17 = vld [vmem:[%s2586_s7 + $0x28] sm:$0xff]  ;;  %vm528_vm6 = vcmask 7168   ;;  %vm514_vm7 = vcmask 138240   ;;  %vm500_vm8 = vcmask 146432  }
  0x11   : > { %v2172_v0 = vld [vmem:[%s458_s15 + $0x8] sm:$0xff]  ;;  %v2174_v1 = vld [vmem:[%s458_s15 + $0x10] sm:$0xff]  ;;  %v2176_v2 = vld [vmem:[%s458_s15] sm:$0xff]  ;;  %vm486_vm9 = vcmask 154624   ;;  %vm955_vm10 = vcmask 523264   ;;  %vm2075_vm11 = vmmov 0  }
  0x12   : > { %v1991_v3 = vpack.i.bf16 %v2174_v1, %v2172_v0  ;;  %v1986_v4 = vpack.i.bf16 %v2172_v0, %v2176_v2  ;;  %v891_v18 = vld [vmem:[%s2586_s7 + $0x20] sm:$0xff]  ;;  %v890_v19 = vld [vmem:[%s2586_s7 + $0x18] sm:$0xff]  ;;  %v889_v20 = vld [vmem:[%s2586_s7 + $0x10] sm:$0xff]  ;;  %s2078_s15 = smov 92   ;;  %vm1414_vm12 = vcmask 1031168   ;;  %vm1472_vm13 = vcmask 883712  }
  0x13   : > { %v888_v21 = vld [vmem:[%s2586_s7 + $0x8] sm:$0xff]  ;;  %v887_v22 = vld [vmem:[%s2586_s7] sm:$0xff]  ;;  %vm1492_vm14 = vcmask 752640   ;;  %vm1512_vm15 = vcmask 744448  }
  0x14   : > { %1992 = vrot.lane.b32.xlu1 %v1991_v3, %s2065_s16  ;;  %1987 = vrot.lane.b32.xlu0 %v1986_v4, %s2066_s17  ;;  %v1543_v23 = vld [vmem:[%s2588_s9] sm:$0xff] }
  0x18   : > { %1997 = vrot.lane.b32.xlu1 %v1991_v3, %s2067_s18  ;;  %581 = vrot.lane.b32.xlu0 %v2174_v1, %s2066_s17 }
  0x1c   : > { %563 = vrot.lane.b32.xlu1 %v2176_v2, %s2067_s18  ;;  %549 = vrot.lane.b32.xlu0 %v2176_v2, %s2065_s16  ;;  %s2079_s16 = smov 91  }
  0x20   : > { %535 = vrot.lane.b32.xlu1 %v2176_v2, %s2068_s19  ;;  %2002 = vrot.lane.b32.xlu0 %v1991_v3, %s2068_s19 }
  0x24   : > { %2012 = vrot.lane.b32.xlu1 %v1986_v4, %s2069_s20  ;;  %2007 = vrot.lane.b32.xlu0 %v1986_v4, %s2070_s21 }
  0x28   : > { %521 = vrot.lane.b32.xlu1 %v2174_v1, %s2069_s20  ;;  %507 = vrot.lane.b32.xlu0 %v2174_v1, %s2070_s21  ;;  %s1954_s20 = smul.u32 12, %s2594_s30 }
  0x2a   : > { %s463_s23 = scalar_lea.vmem %s2580_s1, %s1954_s20  ;;  %s468_s28 = scalar_lea.vmem %s2591_s12, %s1954_s20 }
  0x2c   : > { %2022 = vrot.lane.b32.xlu1 %v1986_v4, %s2072_s24  ;;  %2017 = vrot.lane.b32.xlu0 %v1986_v4, %s2073_s25 }
  0x30   : > { %493 = vrot.lane.b32.xlu1 %v2174_v1, %s2072_s24  ;;  %477 = vrot.lane.b32.xlu0 %v2174_v1, %s2073_s25 }
  0x34   : > { %654 = vperm.xlu0 %2026, %v620_v7   ;;  %659 = vperm.xlu1 %2027, %v621_v8  }
  0x38   : > { %649 = vperm.xlu0 %2026, %v619_v9   ;;  %644 = vperm.xlu1 %2027, %v618_v10  }
  0x3c   : > { %639 = vperm.xlu0 %2026, %v617_v11   ;;  %634 = vperm.xlu1 %2027, %v616_v12  }
  0x40   : > { %629 = vperm.xlu0 %2026, %v615_v13   ;;  %624 = vperm.xlu1 %2027, %v614_v14  }
  0x44   : > { %932 = vperm.xlu0 %2026, %v894_v15   ;;  %927 = vperm.xlu1 %2027, %v893_v16  }
  0x48   : > { %922 = vperm.xlu0 %2026, %v892_v17   ;;  %917 = vperm.xlu1 %2027, %v891_v18  }
  0x4c   : > { %912 = vperm.xlu0 %2026, %v890_v19   ;;  %907 = vperm.xlu1 %2027, %v889_v20  }
  0x50   : > { %902 = vperm.xlu0 %2026, %v888_v21   ;;  %897 = vperm.xlu1 %2027, %v887_v22  }
  0x54   : > { %1546 = vperm.xlu0 %2026, %v1543_v23  }
  0x86   : > { %v1993_v24 = vpop.permute.xlu1 %1992  ;;  %v1988_v25 = vpop.permute.xlu0 %1987 }
  0x87   : > { %v1990_v26 = vunpack.i.h.bf16 %v1988_v25  ;;  %v1989_v27 = vunpack.i.l.bf16 %v1988_v25  ;;  %v1995_v28 = vunpack.i.h.bf16 %v1993_v24  ;;  %v1994_v29 = vunpack.i.l.bf16 %v1993_v24 }
  0x89   : > { %v584_v30 = vsel %vm583_vm1, %v1989_v27, %v1990_v26  ;;  %v557_v40 = vsel %vm555_vm3, %v1994_v29, %v1995_v28 }
  0x8a   : > { %v1998_v31 = vpop.permute.xlu1 %1997  ;;  %v582_v32 = vpop.permute.xlu0 %581  ;;  %v603_v33 = vpack.c.bf16 %v584_v30, %v584_v30 }
  0x8b   : > { %v2000_v34 = vunpack.i.h.bf16 %v1998_v31  ;;  %v1999_v35 = vunpack.i.l.bf16 %v1998_v31  ;;  %v585_v36 = vsel %vm583_vm1, %v1990_v26, %v582_v32  ;;  %v590_v37 = vsel %vm583_vm1, %v582_v32, %v1989_v27 }
  0x8c   : > { %v604_v38 = vpack.c.bf16 %v585_v36, %v585_v36  ;;  %v605_v39 = vpack.c.bf16 %v590_v37, %v590_v37  ;;  %v697_v44 = vsel %vm695_vm4, %v603_v33, 0  ;;  %v2030_v36 = vld [vmem:[%s2583_s4 + $0x10] sm:$0xff]   ;;  %v2031_v37 = vld [vmem:[%s2583_s4 + $0x18] sm:$0xff]  }
  0x8d   : > { %v571_v41 = vsel %vm569_vm2, %v1999_v35, %v2000_v34 }
  0x8e   : > { %v564_v42 = vpop.permute.xlu1 %563  ;;  %v550_v43 = vpop.permute.xlu0 %549  ;;  %1826 = vmatprep.subr.msk.bf16.mxu0 %vm695_vm4, %v604_v38  ;;  %1952 = vmatprep.subr.msk.bf16.mxu1 %vm695_vm4, %v605_v39  ;;  %v703_v45 = vsel %vm695_vm4, %v605_v39, 0  ;;  %v601_v46 = vpack.c.bf16 %v571_v41, %v557_v40 }
  0x8f   : > { %v570_v47 = vsel %vm569_vm2, %v564_v42, %v1999_v35  ;;  %v576_v48 = vsel %vm569_vm2, %v2000_v34, %v564_v42  ;;  %v556_v49 = vsel %vm555_vm3, %v550_v43, %v1994_v29  ;;  %v562_v50 = vsel %vm555_vm3, %v1995_v28, %v550_v43  ;;  %712 = vmatpush1.bf16.msra.mxu0 %v697_v44  ;;  %v2029_v35 = vld [vmem:[%s2583_s4 + $0x8] sm:$0xff]  }
  0x90   : > { %v600_v51 = vpack.c.bf16 %v570_v47, %v556_v49  ;;  %v602_v52 = vpack.c.bf16 %v576_v48, %v562_v50  ;;  %1891 = vmatpush3.bf16.msra.mxu1 %v703_v45  ;;  %713 = vmatprep.subr.bf16.mxu0 %v601_v46 }
  0x92   : > { %v536_v53 = vpop.permute.xlu1 %535  ;;  %v2003_v54 = vpop.permute.xlu0 %2002  ;;  %1892 = vmatprep.subr.bf16.mxu1 %v602_v52 }
  0x93   : > { %v2005_v55 = vunpack.i.h.bf16 %v2003_v54  ;;  %v2004_v56 = vunpack.i.l.bf16 %v2003_v54  ;;  %714 = vmatpush1.bf16.msra.mxu0 %v600_v51 }
  0x94   : > { %1893 = vmatpush3.bf16.msra.mxu1 %v602_v52 }
  0x95   : > { %v543_v57 = vsel %vm541_vm5, %v2004_v56, %v2005_v55  ;;  %v548_v58 = vsel %vm541_vm5, %v2005_v55, %v536_v53  ;;  %v542_v59 = vsel %vm541_vm5, %v536_v53, %v2004_v56 }
  0x96   : > { %v2013_v60 = vpop.permute.xlu1 %2012  ;;  %v2008_v61 = vpop.permute.xlu0 %2007  ;;  %v598_v62 = vpack.c.bf16 %v543_v57, %v2172_v0  ;;  %v599_v63 = vpack.c.bf16 %v548_v58, %v2174_v1  ;;  %v597_v3 = vpack.c.bf16 %v542_v59, %v2176_v2 }
  0x97   : > { %v2015_v4 = vunpack.i.h.bf16 %v2013_v60  ;;  %v2014_v7 = vunpack.i.l.bf16 %v2013_v60  ;;  %v2010_v8 = vunpack.i.h.bf16 %v2008_v61  ;;  %v2009_v9 = vunpack.i.l.bf16 %v2008_v61 }
  0x98   : > { %715 = vmatprep.subr.bf16.mxu0 %v598_v62  ;;  %1894 = vmatprep.subr.bf16.mxu1 %v599_v63 }
  0x99   : > { %716 = vmatpush1.bf16.msra.mxu0 %v597_v3  ;;  %1895 = vmatpush3.bf16.msra.mxu1 %v599_v63  ;;  %v515_v10 = vsel %vm514_vm7, %v2009_v9, %v2010_v8  ;;  %v529_v11 = vsel %vm528_vm6, %v2014_v7, %v2015_v4 }
  0x9a   : > { %v522_v12 = vpop.permute.xlu1 %521  ;;  %v508_v13 = vpop.permute.xlu0 %507  ;;  %v595_v0 = vpack.c.bf16 %v529_v11, %v515_v10 }
  0x9b   : > { %v530_v1 = vsel %vm528_vm6, %v2015_v4, %v522_v12  ;;  %v534_v2 = vsel %vm528_vm6, %v522_v12, %v2014_v7  ;;  %v516_v14 = vsel %vm514_vm7, %v2010_v8, %v508_v13  ;;  %v520_v15 = vsel %vm514_vm7, %v508_v13, %v2009_v9 }
  0x9c   : > { %v594_v16 = vpack.c.bf16 %v534_v2, %v520_v15  ;;  %v596_v17 = vpack.c.bf16 %v530_v1, %v516_v14  ;;  %717 = vmatprep.subr.bf16.mxu0 %v595_v0 }
  0x9e   : > { %v2023_v18 = vpop.permute.xlu1 %2022  ;;  %v2018_v19 = vpop.permute.xlu0 %2017  ;;  %718 = vmatpush1.bf16.msra.mxu0 %v594_v16  ;;  %1896 = vmatprep.subr.bf16.mxu1 %v596_v17 }
  0x9f   : > { %v2025_v20 = vunpack.i.h.bf16 %v2023_v18  ;;  %v2024_v21 = vunpack.i.l.bf16 %v2023_v18  ;;  %v2020_v22 = vunpack.i.h.bf16 %v2018_v19  ;;  %v2019_v23 = vunpack.i.l.bf16 %v2018_v19  ;;  %1897 = vmatpush3.bf16.msra.mxu1 %v596_v17 }
  0xa1   : > { %v487_v24 = vsel %vm486_vm9, %v2019_v23, %v2020_v22  ;;  %v501_v25 = vsel %vm500_vm8, %v2024_v21, %v2025_v20 }
  0xa2   : > { %v494_v26 = vpop.permute.xlu1 %493  ;;  %v478_v27 = vpop.permute.xlu0 %477  ;;  %v592_v28 = vpack.c.bf16 %v501_v25, %v487_v24 }
  0xa3   : > { %v502_v29 = vsel %vm500_vm8, %v2025_v20, %v494_v26  ;;  %v506_v30 = vsel %vm500_vm8, %v494_v26, %v2024_v21  ;;  %v488_v31 = vsel %vm486_vm9, %v2020_v22, %v478_v27  ;;  %v492_v32 = vsel %vm486_vm9, %v478_v27, %v2019_v23 }
  0xa4   : > { %v591_v33 = vpack.c.bf16 %v506_v30, %v492_v32  ;;  %v593_v34 = vpack.c.bf16 %v502_v29, %v488_v31  ;;  %719 = vmatprep.subr.bf16.mxu0 %v592_v28 }
  0xa6   : > { %720 = vmatpush1.bf16.msra.mxu0 %v591_v33  ;;  %1898 = vmatprep.subr.bf16.mxu1 %v593_v34 }
  0xa7   : > { %1899 = vmatpush3.bf16.msra.mxu1 %v593_v34 }
  0xa9   : > { %1827 = vmatmul.mubr.msk.bf16.vlgmr.msra.gmra.mxu0 %vm682_vm0, %v2195_v5  ;;  %v2306_v5 = vld [vmem:[%s2585_s6] sm:$0xff]  }
  0xaa   : > { %1901 = vmatmul.mubr.msk.bf16.vlgmr.msra.gmra.mxu1 %vm682_vm0, %v2029_v35  ;;  %747 = vmatprep.mubr.bf16.mxu0 %v2071_v6 }
  0xab   : > { %1904 = vmatprep.mubr.msk.bf16.mxu1 %vm682_vm0, %v2030_v36 }
  0xaf   : > { %v655_v38 = vpop.permute.xlu0 %654  ;;  %v660_v40 = vpop.permute.xlu1 %659 }
  0xb1   : > { %1828 = vmatmul.mubr.msk.bf16.gmra.mxu0 %vm682_vm0, %v2029_v35 }
  0xb2   : > { %1905 = vmatmul.mubr.msk.bf16.gmra.mxu1 %vm682_vm0, %v2031_v37  ;;  %757 = vmatprep.mubr.bf16.mxu0 %v2071_v6 }
  0xb3   : > { %1000 = vmatprep.mubr.bf16.mxu1 %v2071_v6  ;;  %v650_v46 = vpop.permute.xlu0 %649  ;;  %v2318_v48 = vpop.permute.xlu1 %644 }
  0xb7   : > { %v640_v55 = vpop.permute.xlu0 %639  ;;  %v2323_v58 = vpop.permute.xlu1 %634 }
  0xb9   : > { %1829 = vmatmul.mubr.msk.bf16.gmra.mxu0 %vm682_vm0, %v2030_v36  ;;  %v2033_v36 = vld [vmem:[%s2585_s6 + $0x8] sm:$0xff]  }
  0xba   : > { %767 = vmatprep.mubr.bf16.mxu0 %v2071_v6 }
  0xbb   : > { %v630_v0 = vpop.permute.xlu0 %629  ;;  %v2326_v1 = vpop.permute.xlu1 %624 }
  0xc1   : > { %1830 = vmatmul.mubr.msk.bf16.gmra.mxu0 %vm682_vm0, %v2031_v37  ;;  %vm1532_vm0 = vcmask 736256  }
  0xc2   : > { %1916 = vmatprep.mubr.msk.bf16.mxu0 %vm955_vm10, %v2306_v5 }
 0x169   : > { %v2310_v39 = vpop.f32.mrf.mxu0 }
 0x16a   : > { %v1902_v41 = vpop.f32.mrf.mxu1 }
 0x16b   : > { %v2312_v42 = vpop.f32.mrf.mxu0  ;;  %v821_v63 = vadd.f32 %v1902_v41, %v2323_v58 }
 0x16c   : > { %v812_v43 = vpop.f32.mrf.mxu1 }
 0x16d   : > { %v2314_v44 = vpop.f32.mrf.mxu0  ;;  %v851_v2 = vmax.f32 %v821_v63, 0.0  ;;  %v813_v14 = vadd.f32 %v812_v43, %v2326_v1 }
 0x16e   : > { %v1903_v45 = vpop.f32.mrf.mxu1 }
 0x16f   : > { %v2316_v47 = vpop.f32.mrf.mxu0  ;;  %v824_v4 = vadd.f32 %v1903_v45, %v640_v55  ;;  %v845_v20 = vmax.f32 %v813_v14, 0.0 }
 0x170   : > { %v815_v49 = vpop.f32.mrf.mxu1 }
 0x171   : > { %v2320_v50 = vpop.f32.mrf.mxu0  ;;  %v854_v15 = vmax.f32 %v824_v4, 0.0  ;;  %v816_v16 = vadd.f32 %v815_v49, %v630_v0 }
 0x172   : > { %v1906_v51 = vpop.f32.mrf.mxu1 }
 0x173   : > { %v837_v52 = vadd.f32 %v1906_v51, %v655_v38  ;;  %v751_v53 = vpop.f32.mrf.mxu0  ;;  %v872_v21 = vpack.c.bf16 %v854_v15, %v851_v2  ;;  %v848_v22 = vmax.f32 %v816_v16, 0.0  ;;  %v1132_v2 = vlaneseq }
 0x174   : > { %v828_v54 = vpop.f32.mrf.mxu1 }
 0x175   : > { %v829_v56 = vadd.f32 %v828_v54, %v2318_v48  ;;  %v753_v57 = vpop.f32.mrf.mxu0  ;;  %v863_v60 = vmax.f32 %v837_v52, 0.0  ;;  %v869_v25 = vpack.c.bf16 %v848_v22, %v845_v20 }
 0x176   : > { %v1907_v59 = vpop.f32.mrf.mxu1  ;;  %v754_v54 = vadd.f32 %v753_v57, %v640_v55  ;;  %v744_v57 = vadd.f32 %v2314_v44, %v630_v0 }
 0x177   : > { %v840_v61 = vadd.f32 %v1907_v59, %v660_v40  ;;  %v755_v62 = vpop.f32.mrf.mxu0  ;;  %v857_v7 = vmax.f32 %v829_v56, 0.0 }
 0x178   : > { %v831_v3 = vpop.f32.mrf.mxu1  ;;  %v756_v37 = vadd.f32 %v755_v62, %v640_v55 }
 0x179   : > { %v866_v8 = vmax.f32 %v840_v61, 0.0  ;;  %v832_v9 = vadd.f32 %v831_v3, %v650_v46  ;;  %v759_v10 = vpop.f32.mrf.mxu0  ;;  %v852_v3 = vmax.f32 %v754_v54, 0.0 }
 0x17a   : > { %v760_v49 = vadd.f32 %v759_v10, %v2318_v48  ;;  %v853_v61 = vmax.f32 %v756_v37, 0.0 }
 0x17b   : > { %v878_v11 = vpack.c.bf16 %v866_v8, %v863_v60  ;;  %v860_v12 = vmax.f32 %v832_v9, 0.0  ;;  %v761_v13 = vpop.f32.mrf.mxu0  ;;  %v746_v60 = vadd.f32 %v2316_v47, %v630_v0  ;;  %v2035_v47 = vld [vmem:[%s2585_s6 + $0x18] sm:$0xff]   ;;  %v2366_v0 = vpop.permute.xlu1 %927 }
 0x17c   : > { %v762_v32 = vadd.f32 %v761_v13, %v2318_v48  ;;  %v750_v48 = vadd.f32 %v2320_v50, %v2323_v58  ;;  %v855_v63 = vmax.f32 %v760_v49, 0.0  ;;  %v740_v50 = vadd.f32 %v2310_v39, %v2326_v1 }
 0x17d   : > { %v875_v17 = vpack.c.bf16 %v860_v12, %v857_v7  ;;  %v763_v18 = vpop.f32.mrf.mxu0  ;;  %1908 = vmatprep.subr.bf16.mxu0 %v878_v11  ;;  %v847_v7 = vmax.f32 %v746_v60, 0.0  ;;  %v2074_v39 = vmov 0.0  }
 0x17e   : > { %1909 = vmatpush3.bf16.msra.mxu0 %v878_v11  ;;  %v764_v34 = vadd.f32 %v763_v18, %v650_v46  ;;  %v843_v11 = vmax.f32 %v740_v50, 0.0 }
 0x17f   : > { %v765_v19 = vpop.f32.mrf.mxu0  ;;  %1910 = vmatprep.subr.bf16.mxu0 %v875_v17  ;;  %v2372_v18 = vpop.permute.xlu1 %917 }
 0x180   : > { %v766_v27 = vadd.f32 %v765_v19, %v650_v46  ;;  %v856_v46 = vmax.f32 %v762_v32, 0.0  ;;  %v858_v56 = vmax.f32 %v764_v34, 0.0 }
 0x181   : > { %v769_v23 = vpop.f32.mrf.mxu0 }
 0x182   : > { %1911 = vmatpush3.bf16.msra.mxu0 %v875_v17  ;;  %v770_v30 = vadd.f32 %v769_v23, %v655_v38  ;;  %v859_v41 = vmax.f32 %v766_v27, 0.0  ;;  %v873_v4 = vpack.c.bf16 %v858_v56, %v855_v63  ;;  %v2370_v17 = vshrl.u32 %v1132_v2, 7 }
 0x183   : > { %v771_v24 = vpop.f32.mrf.mxu0  ;;  %1912 = vmatprep.subr.bf16.mxu0 %v872_v21 }
 0x184   : > { %v772_v28 = vadd.f32 %v771_v24, %v655_v38  ;;  %v2034_v38 = vld [vmem:[%s2585_s6 + $0x10] sm:$0xff]   ;;  %v861_v51 = vmax.f32 %v770_v30, 0.0  ;;  %v874_v62 = vpack.c.bf16 %v859_v41, %v856_v46  ;;  %v1142_v22 = vsub.s32 2, %v2370_v17  ;;  %v2381_v24 = vld [vmem:[%s2581_s2] sm:$0x7] }
 0x185   : > { %v773_v26 = vpop.f32.mrf.mxu0 }
 0x186   : > { %v774_v29 = vadd.f32 %v773_v26, %v660_v40  ;;  %1913 = vmatpush3.bf16.msra.mxu0 %v872_v21  ;;  %v862_v43 = vmax.f32 %v772_v28, 0.0 }
 0x187   : > { %v775_v31 = vpop.f32.mrf.mxu0  ;;  %1914 = vmatprep.subr.bf16.mxu0 %v869_v25 }
 0x188   : > { %v776_v33 = vadd.f32 %v775_v31, %v660_v40  ;;  %v864_v35 = vmax.f32 %v774_v29, 0.0  ;;  %v752_v40 = vadd.f32 %v751_v53, %v2323_v58  ;;  %v742_v53 = vadd.f32 %v2312_v42, %v2326_v1  ;;  %v2385_v29 = vpop.permute.xlu1 %907 }
 0x189   : > { %v849_v58 = vmax.f32 %v750_v48, 0.0  ;;  %v846_v42 = vmax.f32 %v744_v57, 0.0  ;;  %v1143_v31 = vrot.slane %v2381_v24, %v1142_v22 }
 0x18a   : > { %v865_v45 = vmax.f32 %v776_v33, 0.0  ;;  %1915 = vmatpush3.bf16.msra.mxu0 %v869_v25  ;;  %v876_v59 = vpack.c.bf16 %v864_v35, %v861_v51  ;;  %v850_v55 = vmax.f32 %v752_v40, 0.0  ;;  %v844_v9 = vmax.f32 %v742_v53, 0.0 }
 0x18b   : > { %v870_v10 = vpack.c.bf16 %v852_v3, %v849_v58  ;;  %v867_v12 = vpack.c.bf16 %v846_v42, %v843_v11  ;;  %v2411_v42 = vld [vmem:[%s2587_s8] sm:$0xff]  }
 0x18c   : > { %v877_v52 = vpack.c.bf16 %v865_v45, %v862_v43  ;;  %v871_v8 = vpack.c.bf16 %v853_v61, %v850_v55  ;;  %v868_v44 = vpack.c.bf16 %v847_v7, %v844_v9  ;;  %v2400_v54 = vpop.permute.xlu1 %897 }
 0x18d   : > { %1917 = vmatmul.mubr.msk.bf16.vlgmr.msra.gmra.mxu0 %vm955_vm10, %v2033_v36 }
 0x18e   : > { %976 = vmatprep.subr.bf16.mxu1 %v877_v52  ;;  %1920 = vmatprep.mubr.msk.bf16.mxu0 %vm955_vm10, %v2034_v38 }
 0x18f   : > { %977 = vmatpush1.bf16.msra.mxu1 %v876_v59 }
 0x190   : > { %978 = vmatprep.subr.bf16.mxu1 %v874_v62 }
 0x193   : > { %979 = vmatpush1.bf16.msra.mxu1 %v873_v4 }
 0x194   : > { %980 = vmatprep.subr.bf16.mxu1 %v871_v8 }
 0x195   : > { %1921 = vmatmul.mubr.msk.bf16.gmra.mxu0 %vm955_vm10, %v2035_v47 }
 0x196   : > { %1262 = vmatprep.mubr.bf16.mxu0 %v2071_v6 }
 0x197   : > { %981 = vmatpush1.bf16.msra.mxu1 %v870_v10 }
 0x198   : > { %982 = vmatprep.subr.bf16.mxu1 %v868_v44 }
 0x19b   : > { %983 = vmatpush1.bf16.msra.mxu1 %v867_v12 }
 0x19c   : > { %1924 = vmatprep.subr.bf16.mxu1 %v2074_v39 }
 0x19e   : > { %1839 = vmatmul.mubr.msk.bf16.vlgmr.msra.gmra.mxu1 %vm955_vm10, %v2306_v5  ;;  %v2364_v5 = vpop.permute.xlu0 %932 }
 0x19f   : > { %1010 = vmatprep.mubr.bf16.mxu1 %v2071_v6 }
 0x1a2   : > { %v2368_v15 = vpop.permute.xlu0 %922 }
 0x1a6   : > { %1840 = vmatmul.mubr.msk.bf16.gmra.mxu1 %vm955_vm10, %v2033_v36  ;;  %v2376_v23 = vpop.permute.xlu0 %912 }
 0x1a7   : > { %1020 = vmatprep.mubr.bf16.mxu1 %v2071_v6 }
 0x1ae   : > { %1841 = vmatmul.mubr.msk.bf16.gmra.mxu1 %vm955_vm10, %v2034_v38  ;;  %v2395_v38 = vpop.permute.xlu0 %902 }
 0x1af   : > { %1030 = vmatprep.mubr.bf16.mxu1 %v2071_v6 }
 0x1b6   : > { %1842 = vmatmul.mubr.msk.bf16.gmra.mxu1 %vm955_vm10, %v2035_v47 }
 0x1b7   : > { %1932 = vmatprep.mubr.msk.bf16.mxu1 %vm2075_vm11, %v2074_v39 }
 0x24d   : > { %v1918_v13 = vpop.f32.mrf.mxu0 }
 0x24e   : > { %v1084_v35 = vadd.f32 %v1918_v13, %v2385_v29  ;;  %v2420_v13 = vld [vmem:[%s2587_s8 + $0x8] sm:$0xff]  }
 0x24f   : > { %v1075_v1 = vpop.f32.mrf.mxu0 }
 0x250   : > { %v1114_v56 = vmax.f32 %v1084_v35, 0.0  ;;  %v1076_v59 = vadd.f32 %v1075_v1, %v2400_v54  ;;  %v2439_v35 = vld [vmem:[%s2587_s8 + $0x10] sm:$0xff]  }
 0x251   : > { %v1919_v14 = vpop.f32.mrf.mxu0 }
 0x252   : > { %v1087_v32 = vadd.f32 %v1919_v14, %v2376_v23  ;;  %v1155_v55 = vmul.f32 %v1143_v31, %v1114_v56  ;;  %v1108_v57 = vmax.f32 %v1076_v59, 0.0 }
 0x253   : > { %v1078_v16 = vpop.f32.mrf.mxu0 }
 0x254   : > { %v1117_v49 = vmax.f32 %v1087_v32, 0.0  ;;  %v1079_v51 = vadd.f32 %v1078_v16, %v2395_v38  ;;  %v1149_v8 = vmul.f32 %v1143_v31, %v1108_v57 }
 0x255   : > { %v1922_v19 = vpop.f32.mrf.mxu0 }
 0x256   : > { %v1100_v20 = vadd.f32 %v1922_v19, %v2366_v0  ;;  %v1158_v62 = vmul.f32 %v1143_v31, %v1117_v49  ;;  %v1111_v48 = vmax.f32 %v1079_v51, 0.0  ;;  %v1134_v19 = vsub.s32 0, %v2370_v17 }
 0x257   : > { %v1091_v21 = vpop.f32.mrf.mxu0 }
 0x258   : > { %v1126_v26 = vmax.f32 %v1100_v20, 0.0  ;;  %v1092_v27 = vadd.f32 %v1091_v21, %v2372_v18  ;;  %v1176_v4 = vpack.c.bf16 %v1158_v62, %v1155_v55  ;;  %v1152_v47 = vmul.f32 %v1143_v31, %v1111_v48 }
 0x259   : > { %v1923_v25 = vpop.f32.mrf.mxu0 }
 0x25a   : > { %v1103_v28 = vadd.f32 %v1923_v25, %v2364_v5  ;;  %v1167_v36 = vmul.f32 %v1143_v31, %v1126_v26  ;;  %v1120_v37 = vmax.f32 %v1092_v27, 0.0  ;;  %v1173_v58 = vpack.c.bf16 %v1152_v47, %v1149_v8 }
 0x25b   : > { %v1094_v30 = vpop.f32.mrf.mxu0  ;;  %v1138_v25 = vsub.s32 1, %v2370_v17 }
 0x25c   : > { %v1129_v33 = vmax.f32 %v1103_v28, 0.0  ;;  %v1095_v34 = vadd.f32 %v1094_v30, %v2368_v15  ;;  %v1161_v60 = vmul.f32 %v1143_v31, %v1120_v37 }
 0x25e   : > { %v1170_v41 = vmul.f32 %v1143_v31, %v1129_v33  ;;  %v1123_v43 = vmax.f32 %v1095_v34, 0.0  ;;  %v2393_v45 = vpop.f32.mrf.mxu1 }
 0x260   : > { %v1182_v40 = vpack.c.bf16 %v1170_v41, %v1167_v36  ;;  %v1164_v46 = vmul.f32 %v1143_v31, %v1123_v43  ;;  %v2398_v52 = vpop.f32.mrf.mxu1  ;;  %v1135_v36 = vrot.slane %v2381_v24, %v1134_v19 }
 0x262   : > { %v2403_v61 = vpop.f32.mrf.mxu1  ;;  %1925 = vmatpush3.bf16.msra.mxu1 %v1182_v40  ;;  %v1179_v63 = vpack.c.bf16 %v1164_v46, %v1161_v60 }
 0x263   : > { %1926 = vmatprep.subr.bf16.mxu1 %v2074_v39 }
 0x264   : > { %v1008_v53 = vpop.f32.mrf.mxu1 }
 0x265   : > { %v1009_v51 = vadd.f32 %v1008_v53, %v2395_v38  ;;  %v1005_v53 = vadd.f32 %v2398_v52, %v2400_v54  ;;  %v1003_v52 = vadd.f32 %v2393_v45, %v2400_v54 }
 0x266   : > { %v1012_v3 = vpop.f32.mrf.mxu1  ;;  %1927 = vmatpush3.bf16.msra.mxu1 %v1179_v63 }
 0x267   : > { %1928 = vmatprep.subr.bf16.mxu1 %v2074_v39 }
 0x268   : > { %v1014_v7 = vpop.f32.mrf.mxu1 }
 0x269   : > { %v1015_v43 = vadd.f32 %v1014_v7, %v2385_v29 }
 0x26a   : > { %v1016_v50 = vpop.f32.mrf.mxu1  ;;  %1929 = vmatpush3.bf16.msra.mxu1 %v1176_v4  ;;  %v1007_v4 = vadd.f32 %v2403_v61, %v2395_v38 }
 0x26b   : > { %1930 = vmatprep.subr.bf16.mxu1 %v2074_v39  ;;  %v1017_v40 = vadd.f32 %v1016_v50, %v2376_v23  ;;  %v1110_v50 = vmax.f32 %v1009_v51, 0.0 }
 0x26c   : > { %v1018_v9 = vpop.f32.mrf.mxu1  ;;  %v1109_v38 = vmax.f32 %v1007_v4, 0.0 }
 0x26d   : > { %v1019_v28 = vadd.f32 %v1018_v9, %v2376_v23  ;;  %v1113_v23 = vmax.f32 %v1015_v43, 0.0  ;;  %v1115_v47 = vmax.f32 %v1017_v40, 0.0 }
 0x26e   : > { %v1022_v10 = vpop.f32.mrf.mxu1  ;;  %1931 = vmatpush3.bf16.msra.mxu1 %v1173_v58  ;;  %v1150_v54 = vmul.f32 %v1135_v36, %v1109_v38 }
 0x26f   : > { %v1023_v37 = vadd.f32 %v1022_v10, %v2372_v18  ;;  %v1116_v59 = vmax.f32 %v1019_v28, 0.0  ;;  %v1156_v61 = vmul.f32 %v1135_v36, %v1115_v47 }
 0x270   : > { %v1024_v44 = vpop.f32.mrf.mxu1 }
 0x271   : > { %1933 = vmatmul.mubr.msk.bf16.vlgmr.msra.gmra.mxu1 %vm955_vm10, %v2411_v42  ;;  %v1025_v26 = vadd.f32 %v1024_v44, %v2372_v18  ;;  %v1013_v18 = vadd.f32 %v1012_v3, %v2385_v29  ;;  %v2039_v3 = vld [vmem:[%s2587_s8 + $0x18] sm:$0xff]   ;;  %v1107_v44 = vmax.f32 %v1005_v53, 0.0 }
 0x272   : > { %v1026_v11 = vpop.f32.mrf.mxu1  ;;  %1936 = vmatprep.mubr.msk.bf16.mxu1 %vm2075_vm11, %v2074_v39 }
 0x273   : > { %v1027_v30 = vadd.f32 %v1026_v11, %v2368_v15  ;;  %v1119_v49 = vmax.f32 %v1025_v26, 0.0  ;;  %v1112_v9 = vmax.f32 %v1013_v18, 0.0  ;;  %v2040_v26 = vld [vmem:[%s2587_s8 + $0x20] ss:$0 sps:$4 sm:$0xff]  }
 0x274   : > { %v1028_v12 = vpop.f32.mrf.mxu1 }
 0x275   : > { %v1029_v14 = vadd.f32 %v1028_v12, %v2368_v15  ;;  %v1139_v15 = vrot.slane %v2381_v24, %v1138_v25  ;;  %v1121_v46 = vmax.f32 %v1027_v30, 0.0  ;;  %v1118_v24 = vmax.f32 %v1023_v37, 0.0 }
 0x276   : > { %v1032_v1 = vpop.f32.mrf.mxu1 }
 0x277   : > { %v1033_v20 = vadd.f32 %v1032_v1, %v2366_v0  ;;  %v1122_v32 = vmax.f32 %v1029_v14, 0.0  ;;  %v1160_v55 = vmul.f32 %v1139_v15, %v1119_v49  ;;  %v1162_v7 = vmul.f32 %v1135_v36, %v1121_v46 }
 0x278   : > { %v1034_v2 = vpop.f32.mrf.mxu1  ;;  %v1157_v58 = vmul.f32 %v1139_v15, %v1116_v59  ;;  %v1159_v10 = vmul.f32 %v1135_v36, %v1118_v24  ;;  %v1154_v11 = vmul.f32 %v1139_v15, %v1113_v23  ;;  %v1151_v1 = vmul.f32 %v1139_v15, %v1110_v50 }
 0x279   : > { %v1035_v16 = vadd.f32 %v1034_v2, %v2366_v0  ;;  %1937 = vmatmul.mubr.msk.bf16.gmra.mxu1 %vm955_vm10, %v2420_v13  ;;  %v1124_v41 = vmax.f32 %v1033_v20, 0.0  ;;  %v1163_v60 = vmul.f32 %v1139_v15, %v1122_v32  ;;  %v1106_v14 = vmax.f32 %v1003_v52, 0.0 }
 0x27a   : > { %v1036_v21 = vpop.f32.mrf.mxu1  ;;  %1940 = vmatprep.mubr.msk.bf16.mxu1 %vm2075_vm11, %v2074_v39  ;;  %v1177_v12 = vpack.c.bf16 %v1162_v7, %v1159_v10  ;;  %v1175_v2 = vpack.c.bf16 %v1157_v58, %v1154_v11  ;;  %v1148_v45 = vmul.f32 %v1139_v15, %v1107_v44 }
 0x27b   : > { %v1037_v27 = vadd.f32 %v1036_v21, %v2364_v5  ;;  %v1125_v33 = vmax.f32 %v1035_v16, 0.0  ;;  %v1165_v63 = vmul.f32 %v1135_v36, %v1124_v41  ;;  %v1178_v29 = vpack.c.bf16 %v1163_v60, %v1160_v55 }
 0x27c   : > { %v1038_v31 = vpop.f32.mrf.mxu1  ;;  %v1153_v16 = vmul.f32 %v1135_v36, %v1112_v9  ;;  %v1172_v21 = vpack.c.bf16 %v1151_v1, %v1148_v45 }
 0x27d   : > { %v1127_v34 = vmax.f32 %v1037_v27, 0.0  ;;  %v1039_v0 = vadd.f32 %v1038_v31, %v2364_v5  ;;  %v1166_v62 = vmul.f32 %v1139_v15, %v1125_v33  ;;  %v1147_v27 = vmul.f32 %v1135_v36, %v1106_v14 }
 0x27e   : > { %v1174_v20 = vpack.c.bf16 %v1156_v61, %v1153_v16 }
 0x27f   : > { %v1128_v5 = vmax.f32 %v1039_v0, 0.0  ;;  %v1168_v56 = vmul.f32 %v1135_v36, %v1127_v34  ;;  %v1171_v28 = vpack.c.bf16 %v1150_v54, %v1147_v27 }
 0x281   : > { %v1169_v48 = vmul.f32 %v1139_v15, %v1128_v5  ;;  %1941 = vmatmul.mubr.msk.bf16.gmra.mxu1 %vm955_vm10, %v2439_v35  ;;  %v1180_v8 = vpack.c.bf16 %v1168_v56, %v1165_v63 }
 0x282   : > { %1944 = vmatprep.mubr.msk.bf16.mxu1 %vm2075_vm11, %v2074_v39 }
 0x283   : > { %v1181_v57 = vpack.c.bf16 %v1169_v48, %v1166_v62 }
 0x285   : > { %1238 = vmatprep.subr.bf16.mxu0 %v1181_v57 }
 0x286   : > { %1239 = vmatpush1.bf16.msra.mxu0 %v1180_v8 }
 0x287   : > { %1240 = vmatprep.subr.bf16.mxu0 %v1178_v29 }
 0x289   : > { %1945 = vmatmul.mubr.msk.bf16.gmra.mxu1 %vm955_vm10, %v2039_v3 }
 0x28a   : > { %1241 = vmatpush1.bf16.msra.mxu0 %v1177_v12  ;;  %1948 = vmatprep.mubr.msk.bf16.mxu1 %vm2075_vm11, %v2074_v39 }
 0x28b   : > { %1242 = vmatprep.subr.bf16.mxu0 %v1175_v2 }
 0x28e   : > { %1243 = vmatpush1.bf16.msra.mxu0 %v1174_v20 }
 0x28f   : > { %1244 = vmatprep.subr.bf16.mxu0 %v1172_v21 }
 0x291   : > { %1949 = vmatmul.mubr.msk.bf16.gmra.mxu1 %vm955_vm10, %v2040_v26 }
 0x292   : > { %1245 = vmatpush1.bf16.msra.mxu0 %v1171_v28 }
 0x295   : > { %1852 = vmatmul.mubr.msk.bf16.vlgmr.msra.gmra.mxu0 %vm955_vm10, %v2411_v42 }
 0x296   : > { %1272 = vmatprep.mubr.bf16.mxu0 %v2071_v6 }
 0x29d   : > { %1853 = vmatmul.mubr.msk.bf16.gmra.mxu0 %vm955_vm10, %v2420_v13 }
 0x29e   : > { %1282 = vmatprep.mubr.bf16.mxu0 %v2071_v6 }
 0x2a5   : > { %1854 = vmatmul.mubr.msk.bf16.gmra.mxu0 %vm955_vm10, %v2439_v35 }
 0x2a6   : > { %1292 = vmatprep.mubr.bf16.mxu0 %v2071_v6 }
 0x2ad   : > { %1855 = vmatmul.mubr.msk.bf16.gmra.mxu0 %vm955_vm10, %v2039_v3  ;;  %v2509_v3 = vpop.permute.xlu0 %1546 }
 0x2ae   : > { %1302 = vmatprep.mubr.bf16.mxu0 %v2071_v6 }
 0x2b5   : > { %1856 = vmatmul.mubr.msk.bf16.gmra.mxu0 %vm955_vm10, %v2040_v26 }
 0x331   : > { %v2484_v39 = vpop.f32.mrf.mxu1 }
 0x333   : > { %v1934_v42 = vpop.f32.mrf.mxu1 }
 0x335   : > { %v1348_v30 = vpop.f32.mrf.mxu1 }
 0x336   : > { %1393 = vrot.lane.b32.xlu1 %v1348_v30, %s2068_s19 }
 0x337   : > { %v1935_v13 = vpop.f32.mrf.mxu1 }
 0x339   : > { %v1353_v31 = vpop.f32.mrf.mxu1 }
 0x33a   : > { %1412 = vrot.lane.b32.xlu0 %v1353_v31, %s2076_s11 }
 0x33b   : > { %v1938_v32 = vpop.f32.mrf.mxu1 }
 0x33d   : > { %v1356_v33 = vpop.f32.mrf.mxu1 }
 0x33e   : > { %1432 = vrot.lane.b32.xlu1 %v1356_v33, %s2067_s18 }
 0x33f   : > { %v1939_v34 = vpop.f32.mrf.mxu1 }
 0x341   : > { %v1361_v0 = vpop.f32.mrf.mxu1 }
 0x342   : > { %1451 = vrot.lane.b32.xlu0 %v1361_v0, %s2066_s17 }
 0x343   : > { %v1942_v6 = vpop.f32.mrf.mxu1 }
 0x345   : > { %v1364_v35 = vpop.f32.mrf.mxu1 }
 0x346   : > { %1470 = vrot.lane.b32.xlu1 %v1364_v35, %s2077_s14 }
 0x347   : > { %v1943_v36 = vpop.f32.mrf.mxu1 }
 0x349   : > { %v1369_v37 = vpop.f32.mrf.mxu1 }
 0x34a   : > { %1490 = vrot.lane.b32.xlu0 %v1369_v37, %s2078_s15 }
 0x34b   : > { %v1946_v41 = vpop.f32.mrf.mxu1 }
 0x34d   : > { %v1372_v15 = vpop.f32.mrf.mxu1 }
 0x34e   : > { %1510 = vrot.lane.b32.xlu1 %v1372_v15, %s2079_s16 }
 0x34f   : > { %v1947_v43 = vpop.f32.mrf.mxu1 }
 0x351   : > { %v1377_v49 = vpop.f32.mrf.mxu1 }
 0x353   : > { %v1950_v5 = vpop.f32.mrf.mxu1 }
 0x355   : > { %v1264_v51 = vpop.f32.mrf.mxu0  ;;  %v1380_v40 = vpop.f32.mrf.mxu1 }
 0x357   : > { %v2493_v46 = vpop.f32.mrf.mxu0  ;;  %v1951_v56 = vpop.f32.mrf.mxu1 }
 0x359   : > { %v1268_v59 = vpop.f32.mrf.mxu0 }
 0x35a   : > { %1389 = vrot.lane.b32.xlu1 %v1268_v59, %s2068_s19 }
 0x35b   : > { %v1270_v60 = vpop.f32.mrf.mxu0 }
 0x35c   : > { %1391 = vrot.lane.b32.xlu0 %v1270_v60, %s2068_s19  ;;  %s1560_s19 = sld [smem:[#allocation3]] }
 0x35d   : > { %v1274_v62 = vpop.f32.mrf.mxu0 }
 0x35f   : > { %v1276_v48 = vpop.f32.mrf.mxu0 }
 0x360   : > { %1408 = vrot.lane.b32.xlu0 %v1274_v62, %s2076_s11  ;;  %1410 = vrot.lane.b32.xlu1 %v1276_v48, %s2076_s11 }
 0x361   : > { %v1278_v18 = vpop.f32.mrf.mxu0 }
 0x363   : > { %v1280_v24 = vpop.f32.mrf.mxu0 }
 0x364   : > { %1428 = vrot.lane.b32.xlu1 %v1278_v18, %s2067_s18  ;;  %1430 = vrot.lane.b32.xlu0 %v1280_v24, %s2067_s18  ;;  %s1552_s18 = sld [smem:[#allocation2]] }
 0x365   : > { %v1284_v63 = vpop.f32.mrf.mxu0 }
 0x367   : > { %v1286_v53 = vpop.f32.mrf.mxu0 }
 0x368   : > { %1447 = vrot.lane.b32.xlu0 %v1284_v63, %s2066_s17  ;;  %1449 = vrot.lane.b32.xlu1 %v1286_v53, %s2066_s17  ;;  %s2080_s17 = smov 90  }
 0x369   : > { %v1288_v23 = vpop.f32.mrf.mxu0 }
 0x36b   : > { %v1290_v55 = vpop.f32.mrf.mxu0 }
 0x36c   : > { %1466 = vrot.lane.b32.xlu1 %v1288_v23, %s2077_s14  ;;  %1468 = vrot.lane.b32.xlu0 %v1290_v55, %s2077_s14 }
 0x36d   : > { %v1294_v57 = vpop.f32.mrf.mxu0 }
 0x36f   : > { %v1296_v4 = vpop.f32.mrf.mxu0 }
 0x370   : > { %1486 = vrot.lane.b32.xlu0 %v1294_v57, %s2078_s15  ;;  %1488 = vrot.lane.b32.xlu1 %v1296_v4, %s2078_s15 }
 0x371   : > { %v1298_v47 = vpop.f32.mrf.mxu0 }
 0x373   : > { %v1300_v7 = vpop.f32.mrf.mxu0 }
 0x374   : > { %1506 = vrot.lane.b32.xlu1 %v1298_v47, %s2079_s16  ;;  %1508 = vrot.lane.b32.xlu0 %v1300_v7, %s2079_s16 }
 0x375   : > { %v1304_v8 = vpop.f32.mrf.mxu0 }
 0x377   : > { %v1306_v50 = vpop.f32.mrf.mxu0 }
 0x378   : > { %1526 = vrot.lane.b32.xlu1 %v1304_v8, %s2080_s17  ;;  %1528 = vrot.lane.b32.xlu0 %v1306_v50, %s2080_s17 }
 0x379   : > { %v1308_v58 = vpop.f32.mrf.mxu0 }
 0x37b   : > { %v1309_v29 = vpop.f32.mrf.mxu0 }
 0x37c   : > { %1530 = vrot.lane.b32.xlu1 %v1377_v49, %s2080_s17  ;;  %s471_s17 = scalar_lea.vmem %s2592_s13, %s2594_s30 }
 0x3a8   : > { %v1394_v52 = vpop.permute.xlu1 %1393 }
 0x3ac   : > { %v1413_v9 = vpop.permute.xlu0 %1412 }
 0x3b0   : > { %v1433_v10 = vpop.permute.xlu1 %1432 }
 0x3b4   : > { %v1452_v11 = vpop.permute.xlu0 %1451 }
 0x3b8   : > { %v1471_v44 = vpop.permute.xlu1 %1470 }
 0x3bc   : > { %v1491_v61 = vpop.permute.xlu0 %1490 }
 0x3c0   : > { %v1511_v38 = vpop.permute.xlu1 %1510 }
 0x3cc   : > { %v1390_v12 = vpop.permute.xlu1 %1389 }
 0x3cd   : > { %v1401_v30 = vsel %vm541_vm5, %v1394_v52, %v1390_v12 }
 0x3ce   : > { %v1392_v1 = vpop.permute.xlu0 %1391  ;;  %v1404_v6 = vadd.f32 %v1401_v30, %v2484_v39 }
 0x3cf   : > { %v1395_v21 = vsel %vm541_vm5, %v1390_v12, %v1392_v1  ;;  %v1396_v13 = vsel %vm541_vm5, %v1392_v1, %v1394_v52 }
 0x3d0   : > { %v1402_v27 = vadd.f32 %v1395_v21, %v1264_v51  ;;  %v1403_v35 = vadd.f32 %v1396_v13, %v2493_v46 }
 0x3d2   : > { %v1409_v2 = vpop.permute.xlu0 %1408  ;;  %v1411_v14 = vpop.permute.xlu1 %1410 }
 0x3d3   : > { %v1415_v26 = vsel %vm1414_vm12, %v1409_v2, %v1411_v14  ;;  %v1421_v33 = vsel %vm1414_vm12, %v1413_v9, %v1409_v2  ;;  %v1416_v34 = vsel %vm1414_vm12, %v1411_v14, %v1413_v9 }
 0x3d4   : > { %v1422_v32 = vadd.f32 %v1415_v26, %v1402_v27  ;;  %v1424_v5 = vadd.f32 %v1421_v33, %v1404_v6  ;;  %v1423_v51 = vadd.f32 %v1416_v34, %v1403_v35  ;;  %v1556_v26 = vstv %s1552_s18 }
 0x3d6   : > { %v1429_v16 = vpop.permute.xlu1 %1428  ;;  %v1431_v45 = vpop.permute.xlu0 %1430 }
 0x3d7   : > { %v1434_v31 = vsel %vm569_vm2, %v1429_v16, %v1431_v45  ;;  %v1440_v15 = vsel %vm569_vm2, %v1433_v10, %v1429_v16  ;;  %v1435_v43 = vsel %vm569_vm2, %v1431_v45, %v1433_v10  ;;  %vm1720_vm2 = vcmask 0  }
 0x3d8   : > { %v1441_v36 = vadd.f32 %v1434_v31, %v1422_v32  ;;  %v1443_v59 = vadd.f32 %v1440_v15, %v1424_v5  ;;  %v1442_v60 = vadd.f32 %v1435_v43, %v1423_v51  ;;  %v1565_v43 = vld [vmem:[%s463_s23] sm:$0xff]  ;;  %v1566_v51 = vld [vmem:[%s463_s23 + $0x8] sm:$0xf] }
 0x3da   : > { %v1448_v54 = vpop.permute.xlu0 %1447  ;;  %v1450_v20 = vpop.permute.xlu1 %1449 }
 0x3db   : > { %v1453_v0 = vsel %vm583_vm1, %v1448_v54, %v1450_v20  ;;  %v1459_v56 = vsel %vm583_vm1, %v1452_v11, %v1448_v54  ;;  %v1454_v39 = vsel %vm583_vm1, %v1450_v20, %v1452_v11  ;;  %vm1688_vm1 = vcmask 3072  }
 0x3dc   : > { %v1460_v40 = vadd.f32 %v1453_v0, %v1441_v36  ;;  %v1462_v23 = vadd.f32 %v1459_v56, %v1443_v59  ;;  %v1461_v55 = vadd.f32 %v1454_v39, %v1442_v60  ;;  %v1588_v36 = vld [vmem:[%s2582_s3] sm:$0x7] }
 0x3de   : > { %v1467_v28 = vpop.permute.xlu1 %1466  ;;  %v1469_v42 = vpop.permute.xlu0 %1468 }
 0x3df   : > { %v1473_v49 = vsel %vm1472_vm13, %v1467_v28, %v1469_v42  ;;  %v1479_v24 = vsel %vm1472_vm13, %v1471_v44, %v1467_v28  ;;  %v1474_v63 = vsel %vm1472_vm13, %v1469_v42, %v1471_v44  ;;  %v1561_v28 = vstv %s1560_s19 }
 0x3e0   : > { %v1480_v62 = vadd.f32 %v1473_v49, %v1460_v40  ;;  %v1482_v7 = vadd.f32 %v1479_v24, %v1462_v23  ;;  %v1481_v8 = vadd.f32 %v1474_v63, %v1461_v55  ;;  %v1593_v49 = vrot.slane %v1588_v36, %v1134_v19 }
 0x3e2   : > { %v1487_v37 = vpop.permute.xlu0 %1486  ;;  %v1489_v41 = vpop.permute.xlu1 %1488 }
 0x3e3   : > { %v1493_v46 = vsel %vm1492_vm14, %v1487_v37, %v1489_v41  ;;  %v1499_v4 = vsel %vm1492_vm14, %v1491_v61, %v1487_v37  ;;  %v1494_v47 = vsel %vm1492_vm14, %v1489_v41, %v1491_v61  ;;  %v1597_v37 = vrot.slane %v1588_v36, %v1138_v25 }
 0x3e4   : > { %v1500_v57 = vadd.f32 %v1493_v46, %v1480_v62  ;;  %v1502_v44 = vadd.f32 %v1499_v4, %v1482_v7  ;;  %v1501_v11 = vadd.f32 %v1494_v47, %v1481_v8  ;;  %v1601_v25 = vrot.slane %v1588_v36, %v1142_v22 }
 0x3e5   : > { %v1605_v60 = vcombine.low %v1593_v49, %v1597_v37 }
 0x3e6   : > { %v1507_v48 = vpop.permute.xlu1 %1506  ;;  %v1509_v18 = vpop.permute.xlu0 %1508 }
 0x3e7   : > { %v1513_v53 = vsel %vm1512_vm15, %v1507_v48, %v1509_v18  ;;  %v1519_v52 = vsel %vm1512_vm15, %v1511_v38, %v1507_v48  ;;  %v1514_v9 = vsel %vm1512_vm15, %v1509_v18, %v1511_v38 }
 0x3e8   : > { %v1520_v50 = vadd.f32 %v1513_v53, %v1500_v57  ;;  %v1522_v1 = vadd.f32 %v1519_v52, %v1502_v44  ;;  %v1521_v2 = vadd.f32 %v1514_v9, %v1501_v11 }
 0x3ea   : > { %v1527_v58 = vpop.permute.xlu1 %1526  ;;  %v1529_v29 = vpop.permute.xlu0 %1528 }
 0x3eb   : > { %v1533_v10 = vsel %vm1532_vm0, %v1527_v58, %v1529_v29 }
 0x3ec   : > { %v1540_v12 = vadd.f32 %v1533_v10, %v1520_v50 }
 0x3ee   : > { %v1549_v14 = vadd.f32 %v2509_v3, %v1540_v12  ;;  %v1531_v16 = vpop.permute.xlu1 %1530 }
 0x3ef   : > { %v1534_v61 = vsel %vm1532_vm0, %v1529_v29, %v1531_v16  ;;  %v1539_v45 = vsel %vm1532_vm0, %v1531_v16, %v1527_v58 }
 0x3f0   : > { %2041 = vtanh.f32 %v1549_v14  ;;  %v1541_v54 = vadd.f32 %v1534_v61, %v1521_v2  ;;  %v1542_v20 = vadd.f32 %v1539_v45, %v1522_v1 }
 0x3f2   : > { %v1550_v21 = vadd.f32 %v2509_v3, %v1541_v54  ;;  %v1551_v38 = vadd.f32 %v2509_v3, %v1542_v20 }
 0x3f4   : > { %2043 = vtanh.f32 %v1550_v21  ;;  %v1584_v59 = vcombine.low %v1549_v14, %v1550_v21 }
 0x3f5   : > { %2045 = vtanh.f32 %v1551_v38 }
 0x3fd   : > { %v2042_v27 = vpop.eup %2041 }
 0x3fe   : > { %v1557_v42 = vmul.f32 %v2042_v27, %v1556_v26 }
 0x400   : > { %v1562_v30 = vadd.f32 %v1561_v28, %v1557_v42 }
 0x401   : > { %v2044_v13 = vpop.eup %2043 }
 0x402   : > { %v2046_v31 = vpop.eup %2045  ;;  %v1558_v32 = vmul.f32 %v2044_v13, %v1556_v26  ;;  %v1567_v34 = vmul.f32 1.442695, %v1562_v30  ;;  %v1631_v48 = vmul.f32 %v1593_v49, %v1562_v30  ;;  %v2081_v13 = vmov 839922192  }
 0x403   : > { %v1559_v33 = vmul.f32 %v2046_v31, %v1556_v26  ;;  %v1664_v31 = vunpack.c.l.s4 %v2081_v13 }
 0x404   : > { %v1563_v0 = vadd.f32 %v1561_v28, %v1558_v32  ;;  %2047 = vpow2.f32 %v1567_v34  ;;  %v1637_v23 = vrot.slane %v1631_v48, 4 }
 0x405   : > { %v1564_v6 = vadd.f32 %v1561_v28, %v1559_v33 }
 0x406   : > { %v1569_v35 = vmul.f32 1.442695, %v1563_v0  ;;  %v1632_v39 = vmul.f32 %v1597_v37, %v1563_v0  ;;  %v1643_v22 = vsel %vm695_vm4, %v1637_v23, 0.0  ;;  %v1665_v0 = vunpack.c.0.s8 %v1664_v31 }
 0x407   : > { %v1571_v3 = vmul.f32 1.442695, %v1564_v6  ;;  %v1633_v4 = vmul.f32 %v1601_v25, %v1564_v6 }
 0x408   : > { %2049 = vpow2.f32 %v1569_v35  ;;  %v1638_v63 = vrot.slane %v1632_v39, 4 }
 0x409   : > { %2051 = vpow2.f32 %v1571_v3  ;;  %v1639_v44 = vrot.slane %v1633_v4, 4  ;;  %v1668_v3 = vsub.s32 %v1665_v0, %v2370_v17 }
 0x40a   : > { %v1644_v47 = vsel %vm695_vm4, %v1638_v63, 0.0 }
 0x40b   : > { %v1645_v1 = vadd.f32 %v1644_v47, %v1643_v22  ;;  %v1646_v16 = vsel %vm695_vm4, %v1639_v44, 0.0 }
 0x40d   : > { %v1647_v61 = vadd.f32 %v1646_v16, %v1645_v1 }
 0x411   : > { %v2048_v41 = vpop.eup %2047 }
 0x415   : > { %v2050_v15 = vpop.eup %2049 }
 0x416   : > { %v2052_v5 = vpop.eup %2051  ;;  %v1576_v40 = vcombine.high %v2048_v41, %v2050_v15 }
 0x417   : > { %v1577_v56 = vcombine.high %v2052_v5, %v2052_v5 }
 0x418   : > { %v1580_v46 = vmul.f32 %v1576_v40, %v1565_v43 }
 0x419   : > { %v1581_v62 = vmul.f32 %v1577_v56, %v1566_v51 }
 0x41a   : > { %v2550_v18 = vadd.f32 %v1584_v59, %v1580_v46 }
 0x41b   : > { %v1587_v24 = vadd.f32 %v1581_v62, %v1551_v38 }
 0x41c   : > { %v1607_v53 = vmul.f32 %v1605_v60, %v2550_v18 }
 0x41d   : > { %v1608_v19 = vmul.f32 %v1601_v25, %v1587_v24 }
 0x41e   : > { %v1610_v55 = vcombine.high %v1607_v53, %v1607_v53  ;;  %v1619_v57 = vmul.f32 %v1607_v53, %v2550_v18  ;;  %v1612_v7 = vsel %vm695_vm4, %v1607_v53, 0.0 }
 0x41f   : > { %v1620_v50 = vmul.f32 %v1608_v19, %v1587_v24  ;;  %v1615_v52 = vsel %vm695_vm4, %v1608_v19, 0.0 }
 0x420   : > { %v1613_v8 = vsel %vm695_vm4, %v1610_v55, 0.0  ;;  %v1622_v58 = vcombine.high %v1619_v57, %v1619_v57  ;;  %v1624_v9 = vsel %vm695_vm4, %v1619_v57, 0.0 }
 0x421   : > { %v1614_v29 = vadd.f32 %v1613_v8, %v1612_v7  ;;  %v1627_v2 = vsel %vm695_vm4, %v1620_v50, 0.0 }
 0x422   : > { %v1625_v10 = vsel %vm695_vm4, %v1622_v58, 0.0 }
 0x423   : > { %v1616_v11 = vadd.f32 %v1615_v52, %v1614_v29  ;;  %v1626_v12 = vadd.f32 %v1625_v10, %v1624_v9 }
 0x425   : > { %1617 = vadd.xlane.f32.xlu0 %v1616_v11  ;;  %v1628_v14 = vadd.f32 %v1627_v2, %v1626_v12 }
 0x427   : > { %1629 = vadd.xlane.f32.xlu1 %v1628_v14 }
 0x429   : > { %1648 = vadd.xlane.f32.xlu0 %v1647_v61 }
 0x4ae   : > { %v1618_v45 = vpop.xlane.xlu0 %1617 }
 0x4af   : > { %v1658_v54 = vmul.f32 0.00390625, %v1618_v45  ;;  %v1689_v20 = vsel %vm1688_vm1, %v1618_v45, 0.0 }
 0x4b0   : > { %v1630_v21 = vpop.xlane.xlu1 %1629  ;;  %1690 = vadd.xlane.f32.xlu0 %v1689_v20 }
 0x4b1   : > { %v1660_v38 = vmul.f32 %v1658_v54, %v1658_v54  ;;  %v1659_v26 = vmul.f32 0.00390625, %v1630_v21  ;;  %v1701_v27 = vsel %vm1688_vm1, %v1630_v21, 0.0  ;;  %v1669_v37 = vrot.slane %v1658_v54, %v1668_v3 }
 0x4b2   : > { %1702 = vadd.xlane.f32.xlu1 %v1701_v27  ;;  %v1649_v28 = vpop.xlane.xlu0 %1648 }
 0x4b3   : > { %v1661_v42 = vsub.f32 %v1659_v26, %v1660_v38  ;;  %v1650_v30 = vrot.slane %v1649_v28, 4  ;;  %v1671_v15 = vsub.f32 %v2550_v18, %v1669_v37  ;;  %v1672_v43 = vsub.f32 %v1587_v24, %v1669_v37 }
 0x4b5   : > { %v1673_v32 = vadd.f32 1e-05, %v1661_v42  ;;  %v1651_v33 = vadd.f32 %v1650_v30, %v1649_v28 }
 0x4b7   : > { %2053 = vrsqrt.f32 %v1673_v32  ;;  %v1652_v34 = vrot.slane %v1651_v33, 2 }
 0x4b9   : > { %v1653_v6 = vadd.f32 %v1652_v34, %v1651_v33 }
 0x4bb   : > { %v1654_v35 = vrot.slane %v1653_v6, 1 }
 0x4bd   : > { %v1655_v36 = vadd.f32 %v1654_v35, %v1653_v6 }
 0x4bf   : > { %1955 = vpush %v1655_v36 }
 0x4c4   : > { %v2054_v41 = vpop.eup %2053 }
 0x4c5   : > { %v1682_v49 = vrot.slane %v2054_v41, %v1668_v3 }
 0x4c7   : > { %v1684_v5 = vmul.f32 %v1682_v49, %v1671_v15  ;;  %v1685_v51 = vmul.f32 %v1682_v49, %v1672_v43 }
 0x4c9   : > { %1686 = vst [vmem:[%s468_s28] sm:$0xff] %v1684_v5  ;;  %1687 = vst [vmem:[%s468_s28 + $0x8] sm:$0xf] %v1685_v51 }
 0x4f0   : > { %s1956_s10 = spop %1955 }
 0x4f1   : > { %v1657_v29 = vstv %s1956_s10 }
 0x539   : > { %v1691_v40 = vpop.xlane.xlu0 %1690 }
 0x53a   : > { %v1692_v56 = vrot.slane %v1691_v40, 4 }
 0x53b   : > { %v1703_v17 = vpop.xlane.xlu1 %1702 }
 0x53c   : > { %v1693_v39 = vadd.f32 %v1692_v56, %v1691_v40  ;;  %v1704_v46 = vrot.slane %v1703_v17, 4 }
 0x53e   : > { %v1694_v59 = vrot.slane %v1693_v39, 2  ;;  %v1705_v60 = vadd.f32 %v1704_v46, %v1703_v17 }
 0x540   : > { %v1695_v62 = vadd.f32 %v1694_v59, %v1693_v39  ;;  %v1706_v48 = vrot.slane %v1705_v60, 2 }
 0x542   : > { %v1707_v18 = vadd.f32 %v1706_v48, %v1705_v60  ;;  %v1696_v25 = vrot.slane %v1695_v62, 1 }
 0x544   : > { %v1697_v24 = vadd.f32 %v1696_v25, %v1695_v62  ;;  %v1708_v63 = vrot.slane %v1707_v18, 1 }
 0x546   : > { %1957 = vpush %v1697_v24  ;;  %v1709_v53 = vadd.f32 %v1708_v63, %v1707_v18 }
 0x548   : > { %1959 = vpush %v1709_v53 }
 0x577   : > { %s1958_s11 = spop %1957 }
 0x578   : > { %v1699_v19 = vstv %s1958_s11 }
 0x579   : > { %v1700_v23 = vmul.f32 0.0009765625, %v1699_v19  ;;  %s1960_s14 = spop %1959 }
 0x57a   : > { %v1711_v55 = vstv %s1960_s14 }
 0x57b   : > { %v1713_v57 = vmul.f32 %v1700_v23, %v1700_v23  ;;  %v1712_v4 = vmul.f32 0.0009765625, %v1711_v55 }
 0x57d   : > { %v1714_v47 = vsub.f32 %v1712_v4, %v1713_v57 }
 0x57f   : > { %v1715_v7 = vadd.f32 1e-05, %v1714_v47 }
 0x581   : > { %2055 = vlog2.f32 %v1715_v7 }
 0x58e   : > { %v2056_v8 = vpop.eup %2055 }
 0x58f   : > { %v1717_v50 = vmul.f32 0.6931472, %v2056_v8 }
 0x591   : > { %v1718_v58 = vmul.f32 0.5, %v1717_v50 }
 0x593   : > { %v1719_v22 = vsub.f32 %v1657_v29, %v1718_v58 }
 0x595   : > { %1721 = vst.msk [vmem:[%s471_s17] sm:$0x1] %vm1720_vm2, %v1719_v22 }
 0x596 PF: > { %s26_s29 = sadd.s32 1, %s2063_s29  }
 0x597   : > { %p23_p4 = scmp.ge.s32.totalorder %s26_s29, 4  }
 0x599   :  { %25 = sbr.rel (!%p23_p4) target bundleno = 3 (0x3), region = 113 }

</bundles_post_ra>
